<compile_context>
chip_gen: v6e
topology: v6e:2x2x1
jax: 0.10.0
libtpu: 0.0.40
codegen_flags: <defaults>
</compile_context>

<pallas_src>
import functools

import numpy as np
import jax
import jax.numpy as jnp
from jax import lax
from jax.experimental import pallas as pl
from jax.experimental.pallas import tpu as pltpu


# --------------------------------------------------------------------------
# In-kernel helpers for the target kernel (traced, shapes are static)
# --------------------------------------------------------------------------
def _shift_right(x):
    """out[:, j] = x[:, j-1]; out[:, 0] = 0."""
    h, w = x.shape
    return jnp.concatenate([jnp.zeros((h, 1), x.dtype), x[:, : w - 1]], axis=1)


def _shift_down(x):
    """out[i, :] = x[i-1, :]; out[0, :] = 0."""
    h, w = x.shape
    return jnp.concatenate([jnp.zeros((1, w), x.dtype), x[: h - 1, :]], axis=0)


# --------------------------------------------------------------------------
# Kernel 1: multi-resolution gradient target construction (one batch / step)
# --------------------------------------------------------------------------
def _target_kernel(loggt_ref, mask_ref, ph2_ref, pw2t_ref,
                   ggt_ref, gmask_ref, nv_ref, *, H, W, R):
    # loggt_ref, mask_ref : (H, W) f32
    # ph2_ref             : (H//2, H) f32, 2x row-pooling matrix (VMEM resident)
    # pw2t_ref            : (W, W//2) f32, 2x col-pooling matrix (VMEM resident)
    # ggt_ref             : (C, H, W) f32 output
    # gmask_ref           : (C, H, W) bf16 output (values exactly 0/1)
    # nv_ref              : (1, 128) f32 output (num_valid broadcast on lanes)
    C = 2 * R
    mdt = gmask_ref.dtype

    # Zero-init only the channels not fully written by level 0 (plain full
    # channel stores of a constant splat; no register slabs, no masked stores).
    if R > 1:
        zf = jnp.zeros((H, W), jnp.float32)
        zm = jnp.zeros((H, W), mdt)
        for c in range(2, C):
            ggt_ref[c] = zf
            gmask_ref[c] = zm

    lg_sum = loggt_ref[...]          # level-0 block sums == values
    m_sum = mask_ref[...]
    nv = jnp.float32(0.0)

    for i in range(R):               # static python loop (R small)
        r = 2 ** i
        hr, wr = H // r, W // r
        if i > 0:
            # hierarchical 2x pool of the previous level's sums
            hp, wp = H // (r // 2), W // (r // 2)
            ph = ph2_ref[0:hr, 0:hp]        # static slices of resident tiles
            pwt = pw2t_ref[0:wp, 0:wr]
            # log-depth path stays f32 for exactness vs the reference
            lg_sum = jnp.dot(
                jnp.dot(ph, lg_sum, preferred_element_type=jnp.float32),
                pwt, preferred_element_type=jnp.float32)
            # mask-count path: exact small integers -> bf16 MXU (native rate),
            # f32 accumulation keeps the counts exact for practical R.
            tmp = jnp.dot(ph.astype(jnp.bfloat16), m_sum.astype(jnp.bfloat16),
                          preferred_element_type=jnp.float32)
            m_sum = jnp.dot(tmp.astype(jnp.bfloat16), pwt.astype(jnp.bfloat16),
                            preferred_element_type=jnp.float32)

        valid = m_sum > 0.0
        den = jnp.where(valid, m_sum, jnp.float32(r * r))   # NaN-free renorm
        lg_r = lg_sum / den                                  # avg over valid px
        m_r = jnp.where(valid, 1.0, 0.0).astype(jnp.float32)

        # finite differences at (hr, wr), border masked in registers
        col = lax.broadcasted_iota(jnp.int32, (hr, wr), 1)
        row = lax.broadcasted_iota(jnp.int32, (hr, wr), 0)
        keep_u = (col >= 1).astype(jnp.float32)
        keep_v = (row >= 1).astype(jnp.float32)

        du = (lg_r - _shift_right(lg_r)) * keep_u     # horizontal gradient
        mu = m_r * _shift_right(m_r)                  # col 0 auto-zero
        dv = (lg_r - _shift_down(lg_r)) * keep_v      # vertical gradient
        mv = m_r * _shift_down(m_r)                   # row 0 auto-zero

        # num_valid contribution (data already in registers; kernel 1 is not
        # XLU-bound, and this removes a reduce from the loss kernel inner loop)
        nv = nv + jnp.sum(mu) + jnp.sum(mv)

        # sub-region stores: register working set stays at the (hr, wr) level
        # size; rows hr:H / cols wr:W were zeroed above.
        ggt_ref[2 * i, 0:hr, 0:wr] = du
        gmask_ref[2 * i, 0:hr, 0:wr] = mu.astype(mdt)
        ggt_ref[2 * i + 1, 0:hr, 0:wr] = dv
        gmask_ref[2 * i + 1, 0:hr, 0:wr] = mv.astype(mdt)

    nv_ref[...] = jnp.full((1, 128), nv, jnp.float32)


def build_grad_targets(log_gt, mask, resolution):
    """log_gt, mask: (B, H, W) f32 ->
       (log_grad_gt (B,2R,H,W) f32, log_grad_mask (B,2R,H,W) bf16, num_valid (B,))."""
    B, H, W = log_gt.shape
    C = 2 * resolution
    h2, w2 = max(H // 2, 1), max(W // 2, 1)
    # 2x pooling matrices, built ONCE in JAX and kept VMEM-resident across the
    # whole batch grid (constant index_map); level-i matrices are their
    # top-left corners (self-similar pattern).
    ph2 = jnp.asarray(
        (np.arange(H)[None, :] // 2 == np.arange(h2)[:, None]).astype(np.float32))
    pw2t = jnp.asarray(
        (np.arange(W)[:, None] // 2 == np.arange(w2)[None, :]).astype(np.float32))

    # Explicit scoped-VMEM budget: 2x-buffered inputs + resident pool matrices
    # + 2x-buffered (f32 ggt + bf16 gmask + nv) outputs, with 2x safety margin.
    # TODO(synk): for very large images (>~1K^2, C>=8) add a channel grid axis
    # or pipeline_mode=pl.Buffered(1) on the outputs to stay under v7x's 64 MiB.
    est = (2 * (2 * H * W * 4) + (h2 * H + W * w2) * 4
           + 2 * (C * H * W * (4 + 2)) + 2 * 128 * 4)
    vmem_limit = int(min(max(2 * est, 32 << 20), 64 << 20))

    kern = functools.partial(_target_kernel, H=H, W=W, R=resolution)
    out_shape = (jax.ShapeDtypeStruct((B, C, H, W), jnp.float32),
                 jax.ShapeDtypeStruct((B, C, H, W), jnp.bfloat16),
                 jax.ShapeDtypeStruct((B, 1, 128), jnp.float32))
    ggt, gmask, nv = pl.pallas_call(
        kern,
        out_shape=out_shape,
        grid_spec=pltpu.PrefetchScalarGridSpec(
            num_scalar_prefetch=0,
            grid=(B,),
            in_specs=[pl.BlockSpec((None, H, W), lambda b: (b, 0, 0)),
                      pl.BlockSpec((None, H, W), lambda b: (b, 0, 0)),
                      pl.BlockSpec((h2, H), lambda b: (0, 0)),    # resident
                      pl.BlockSpec((W, w2), lambda b: (0, 0))],   # resident
            out_specs=[pl.BlockSpec((None, C, H, W), lambda b: (b, 0, 0, 0)),
                       pl.BlockSpec((None, C, H, W), lambda b: (b, 0, 0, 0)),
                       pl.BlockSpec((None, 1, 128), lambda b: (b, 0, 0))]),
        compiler_params=pltpu.CompilerParams(
            dimension_semantics=("parallel",),
            vmem_limit_bytes=vmem_limit),
    )(log_gt, mask, ph2, pw2t)
    return ggt, gmask, nv[:, 0, 0]


# --------------------------------------------------------------------------
# Kernel 2: weighted masked-L1 reduction -> per-(batch, row-tile) partials
# --------------------------------------------------------------------------
def _loss_kernel(w_ref, pred_ref, ggt_ref, gmask_ref, out_ref):
    # grid = (B, T, N): b, t parallel (megacore), n = prediction index
    n = pl.program_id(2)

    pred = pred_ref[...].astype(jnp.float32)     # native dtype -> f32 in VMEM
    d = jnp.abs(pred - ggt_ref[...])
    msk = gmask_ref[...]                          # bf16 0/1, resident across n
    # nan_to_num semantics for NaN (-> 0); Inf at a valid pixel is kept
    # (reference would clamp it to float32 max — loss blows up either way).
    keep = jnp.logical_and(msk != 0, d == d)
    i_loss = jnp.where(keep, d, 0.0)

    # sublane-group reduction: pure vreg-to-vreg VALU adds (no XLU, no SMEM)
    part = i_loss.reshape(-1, 8, 128).sum(axis=0)          # (8, 128)

    @pl.when(n == 0)
    def _():
        out_ref[...] = jnp.zeros_like(out_ref)
    out_ref[...] += w_ref[n] * part


def _plan_flat_layout(total, max_tile_rows=2048):
    """Always lane-dense: lanes=128, rows padded so a legal tile exists."""
    lanes = 128
    rows = -(-total // lanes)                     # ceil
    if rows <= max_tile_rows:
        rows = ((rows + 7) // 8) * 8              # %8 for the sublane-group reduce
        return lanes, rows, rows                  # single full-dim tile
    rows = ((rows + 31) // 32) * 32               # legal for f32 / bf16 / int8 tiles
    tile = 32
    for cand in range(32, max_tile_rows + 1, 32):
        if rows % cand == 0:
            tile = cand                           # largest multiple-of-32 divisor
    return lanes, rows, tile


def _flatten_pad(x, n_lead, rows, lanes):
    """Reshape trailing dims to (rows, lanes), zero-padding the flat tail."""
    lead = x.shape[:n_lead]
    total = int(np.prod(x.shape[n_lead:]))
    flat = x.reshape(*lead, total)
    pad = rows * lanes - total
    if pad:
        flat = jnp.pad(flat, [(0, 0)] * n_lead + [(0, pad)])
    return flat.reshape(*lead, rows, lanes)


def weighted_masked_l1(seq_pred, ggt, gmask, weights, num_valid):
    """seq_pred: (N,B,C,H,W) any float dtype; ggt f32 / gmask bf16: (B,C,H,W)."""
    N, B, C, H, W = seq_pred.shape
    total = C * H * W
    lanes, rows, tile_rows = _plan_flat_layout(total)
    T = rows // tile_rows

    # Zero padding contributes 0 loss (mask pad == 0) and 0 valid count.
    pred_r = _flatten_pad(seq_pred, 2, rows, lanes)   # native dtype (e.g. bf16)
    ggt_r = _flatten_pad(ggt, 1, rows, lanes)
    gmask_r = _flatten_pad(gmask, 1, rows, lanes)

    est = (2 * tile_rows * lanes
           * (seq_pred.dtype.itemsize + ggt.dtype.itemsize + gmask.dtype.itemsize)
           + 2 * 8 * 128 * 4 + 4 * N)
    vmem_limit = int(min(max(2 * est, 32 << 20), 64 << 20))

    out = pl.pallas_call(
        _loss_kernel,
        out_shape=jax.ShapeDtypeStruct((B, T, 8, 128), jnp.float32),
        grid_spec=pltpu.PrefetchScalarGridSpec(
            num_scalar_prefetch=0,
            grid=(B, T, N),
            in_specs=[
                pl.BlockSpec(memory_space=pltpu.MemorySpace.SMEM),   # weights
                # TODO(synk): pipeline_mode=pl.Buffered(3) on pred for v5e.
                pl.BlockSpec((None, None, tile_rows, lanes),
                             lambda b, t, n: (n, b, t, 0)),          # pred
                pl.BlockSpec((None, tile_rows, lanes),
                             lambda b, t, n: (b, t, 0)),             # ggt (resident over n)
                pl.BlockSpec((None, tile_rows, lanes),
                             lambda b, t, n: (b, t, 0)),             # gmask (resident over n)
            ],
            out_specs=pl.BlockSpec((None, None, 8, 128),
                                   lambda b, t, n: (b, t, 0, 0))),
        compiler_params=pltpu.CompilerParams(
            dimension_semantics=("parallel", "parallel", "arbitrary"),
            vmem_limit_bytes=vmem_limit),
    )(weights, pred_r, ggt_r, gmask_r)

    per_b = jnp.sum(out, axis=(1, 2, 3))                 # final reduce in JAX
    return jnp.sum(per_b / (num_valid + 1e-8))


# --------------------------------------------------------------------------
# Glue: full SeqGradL1Loss forward
# --------------------------------------------------------------------------
def _avg_pool2d(x, r):
    B, C, H, W = x.shape
    return x.reshape(B, C, H // r, r, W // r, r).mean(axis=(3, 5))


def seq_grad_l1_loss(seq_pred, gt, *, max_depth, gamma, resolution,
                     depth_activation_format="exp", t_valid=0.0001):
    if isinstance(seq_pred, (list, tuple)):
        seq_pred = jnp.stack(seq_pred, axis=0)
    # seq_pred stays in its native dtype; the loss kernel up-casts in VMEM.
    N, B, C, Hp, Wp = seq_pred.shape
    assert C == 2 * resolution

    gt = jnp.clip(gt.astype(jnp.float32), 0.0, max_depth)
    mask = (gt > t_valid).astype(jnp.float32)

    Hg, Wg = gt.shape[-2:]
    down_rate_h = Hg / Hp
    down_rate_w = Wg / Wp
    assert np.isclose(down_rate_h, down_rate_w)
    down_rate = int(np.round(down_rate_h))
    if down_rate > 1:
        assert down_rate in (2, 4)
        gt = _avg_pool2d(gt, down_rate)
        mask = _avg_pool2d(mask, down_rate)
        safe_mask = jnp.where(mask > 0.0, mask, 1.0)
        gt = jnp.where(mask > 0.0, gt / safe_mask, gt)
        mask = jnp.where(mask > 0.0, 1.0, mask)

    if depth_activation_format == "exp":
        log_gt = jnp.log(gt)
    else:
        log_gt = gt
    log_gt = jnp.where(mask == 0.0, 0.0, log_gt)

    # Pallas kernel 1: multi-resolution gradient targets + per-batch num_valid
    log_grad_gt, log_grad_mask, num_valid = build_grad_targets(
        log_gt[:, 0], mask[:, 0], resolution)

    # Pallas kernel 2: weighted masked-L1 reduction (per-(b,t) partials + JAX sum)
    weights = jnp.asarray((gamma ** (N - 1 - np.arange(N))).astype(np.float32))
    return weighted_masked_l1(seq_pred, log_grad_gt, log_grad_mask, weights,
                              num_valid)


# --------------------------------------------------------------------------
# Pure-JAX reference (silent correctness check)
# --------------------------------------------------------------------------
def _reference_loss(seq_pred, gt, *, max_depth, gamma, resolution,
                    depth_activation_format="exp", t_valid=0.0001):
    seq_pred = seq_pred.astype(jnp.float32)
    N, B, C, Hp, Wp = seq_pred.shape
    gt = jnp.clip(gt.astype(jnp.float32), 0.0, max_depth)
    mask = (gt > t_valid).astype(jnp.float32)
    down_rate = int(round(gt.shape[-2] / Hp))
    if down_rate > 1:
        gt = _avg_pool2d(gt, down_rate)
        mask = _avg_pool2d(mask, down_rate)
        sm = jnp.where(mask > 0.0, mask, 1.0)
        gt = jnp.where(mask > 0.0, gt / sm, gt)
        mask = jnp.where(mask > 0.0, 1.0, mask)
    H, W = gt.shape[-2:]
    log_gt = jnp.log(gt) if depth_activation_format == "exp" else gt
    log_gt = jnp.where(mask == 0.0, 0.0, log_gt)
    lg2, m2 = log_gt[:, 0], mask[:, 0]
    ggt = jnp.zeros((B, C, H, W), jnp.float32)
    gmask = jnp.zeros((B, C, H, W), jnp.float32)
    for i in range(resolution):
        r = 2 ** i
        hr, wr = H // r, W // r
        lgs = lg2.reshape(B, hr, r, wr, r).sum(axis=(2, 4))
        ms = m2.reshape(B, hr, r, wr, r).sum(axis=(2, 4))
        sms = jnp.where(ms > 0.0, ms, 1.0)
        lgr = jnp.where(ms > 0.0, lgs / sms, lgs / (r * r))
        mr = jnp.where(ms > 0.0, 1.0, 0.0)
        ggt = ggt.at[:, 2 * i, :hr, 1:wr].set(lgr[:, :, 1:] - lgr[:, :, :-1])
        gmask = gmask.at[:, 2 * i, :hr, 1:wr].set(mr[:, :, 1:] * mr[:, :, :-1])
        ggt = ggt.at[:, 2 * i + 1, 1:hr, :wr].set(lgr[:, 1:, :] - lgr[:, :-1, :])
        gmask = gmask.at[:, 2 * i + 1, 1:hr, :wr].set(mr[:, 1:, :] * mr[:, :-1, :])
    num_valid = jnp.sum(gmask, axis=(1, 2, 3))
    loss = 0.0
    for i in range(N):
        w = gamma ** (N - 1 - i)
        il = jnp.nan_to_num(jnp.abs(seq_pred[i] - ggt) * gmask)
        il = jnp.sum(il, axis=(1, 2, 3)) / (num_valid + 1e-8)
        loss += w * jnp.sum(il)
    return loss


if __name__ == "__main__":
    key = jax.random.PRNGKey(0)
    B, R, H, W, N = 2, 3, 16, 16, 4
    C = 2 * R
    max_depth = 10.0
    gamma = 0.8

    k1, k2, k3 = jax.random.split(key, 3)
    gt = jax.random.uniform(k1, (B, 1, H, W), jnp.float32, 0.0, 12.0)
    holes = (jax.random.uniform(k2, (B, 1, H, W)) > 0.3).astype(jnp.float32)
    gt = gt * holes                                   # sparse depth: zeros invalid
    # predictions kept in bf16 (native dtype) — the loss kernel up-casts in VMEM
    seq_pred = (0.1 * jax.random.normal(k3, (N, B, C, H, W), jnp.float32)
                ).astype(jnp.bfloat16)

    loss = seq_grad_l1_loss(seq_pred, gt, max_depth=max_depth, gamma=gamma,
                            resolution=R, depth_activation_format="exp")
    loss = jax.block_until_ready(loss)

    ref = jax.block_until_ready(
        _reference_loss(seq_pred, gt, max_depth=max_depth, gamma=gamma,
                        resolution=R, depth_activation_format="exp"))
    assert np.isfinite(float(loss))
    assert np.isclose(float(loss), float(ref), rtol=5e-4, atol=1e-5), (loss, ref)
    print("KERNEL_OK")
</pallas_src>

<mosaic_0001>
module attributes {stable_mosaic.version = 11 : i64} {
  func.func @_target_kernel(%arg0: i32, %arg1: memref<1x16x16xf32, #tpu.memory_space<vmem>>, %arg2: memref<1x16x16xf32, #tpu.memory_space<vmem>>, %arg3: memref<8x16xf32, #tpu.memory_space<vmem>>, %arg4: memref<16x8xf32, #tpu.memory_space<vmem>>, %arg5: memref<1x6x16x16xf32, #tpu.memory_space<vmem>>, %arg6: memref<1x6x16x16xbf16, #tpu.memory_space<vmem>>, %arg7: memref<1x1x128xf32, #tpu.memory_space<vmem>>) attributes {dimension_semantics = [#tpu.dimension_semantics<parallel>], iteration_bounds = array<i64: 2>, scalar_prefetch = 0 : i64, scratch_operands = 0 : i64, tpu.core_type = #tpu.core_type<tc>, window_params = [{transform_indices = @transform_0, window_bounds = array<i64: 1, 16, 16>}, {transform_indices = @transform_1, window_bounds = array<i64: 1, 16, 16>}, {pipeline_mode = #tpu.pipeline_mode<synchronous>, transform_indices = @transform_2, window_bounds = array<i64: 8, 16>}, {pipeline_mode = #tpu.pipeline_mode<synchronous>, transform_indices = @transform_3, window_bounds = array<i64: 16, 8>}, {transform_indices = @transform_4, window_bounds = array<i64: 1, 6, 16, 16>}, {transform_indices = @transform_5, window_bounds = array<i64: 1, 6, 16, 16>}, {transform_indices = @transform_6, window_bounds = array<i64: 1, 1, 128>}]} {
    %cst = arith.constant 0.000000e+00 : f32
    %0 = vector.broadcast %cst : f32 to vector<16x16xf32>
    %cst_0 = arith.constant 0.000000e+00 : bf16
    %1 = vector.broadcast %cst_0 : bf16 to vector<16x16xbf16>
    %c0 = arith.constant 0 : index
    %c2 = arith.constant 2 : index
    %c0_1 = arith.constant 0 : index
    %c0_2 = arith.constant 0 : index
    %2 = vector.load %arg5[%c0, %c2, %c0_1, %c0_2] : memref<1x6x16x16xf32, #tpu.memory_space<vmem>>, vector<1x1x16x16xf32>
    %3 = vector.shape_cast %2 : vector<1x1x16x16xf32> to vector<16x16xf32>
    %4 = vector.shape_cast %0 : vector<16x16xf32> to vector<1x1x16x16xf32>
    tpu.vector_store %arg5[%c0, %c2, %c0_1, %c0_2], %4 {strides = array<i32>} : memref<1x6x16x16xf32, #tpu.memory_space<vmem>>, vector<1x1x16x16xf32>,
    %c0_3 = arith.constant 0 : index
    %c2_4 = arith.constant 2 : index
    %c0_5 = arith.constant 0 : index
    %c0_6 = arith.constant 0 : index
    %5 = vector.load %arg6[%c0_3, %c2_4, %c0_5, %c0_6] : memref<1x6x16x16xbf16, #tpu.memory_space<vmem>>, vector<1x1x16x16xbf16>
    %6 = vector.shape_cast %5 : vector<1x1x16x16xbf16> to vector<16x16xbf16>
    %7 = vector.shape_cast %1 : vector<16x16xbf16> to vector<1x1x16x16xbf16>
    tpu.vector_store %arg6[%c0_3, %c2_4, %c0_5, %c0_6], %7 {strides = array<i32>} : memref<1x6x16x16xbf16, #tpu.memory_space<vmem>>, vector<1x1x16x16xbf16>,
    %c0_7 = arith.constant 0 : index
    %c3 = arith.constant 3 : index
    %c0_8 = arith.constant 0 : index
    %c0_9 = arith.constant 0 : index
    %8 = vector.load %arg5[%c0_7, %c3, %c0_8, %c0_9] : memref<1x6x16x16xf32, #tpu.memory_space<vmem>>, vector<1x1x16x16xf32>
    %9 = vector.shape_cast %8 : vector<1x1x16x16xf32> to vector<16x16xf32>
    %10 = vector.shape_cast %0 : vector<16x16xf32> to vector<1x1x16x16xf32>
    tpu.vector_store %arg5[%c0_7, %c3, %c0_8, %c0_9], %10 {strides = array<i32>} : memref<1x6x16x16xf32, #tpu.memory_space<vmem>>, vector<1x1x16x16xf32>,
    %c0_10 = arith.constant 0 : index
    %c3_11 = arith.constant 3 : index
    %c0_12 = arith.constant 0 : index
    %c0_13 = arith.constant 0 : index
    %11 = vector.load %arg6[%c0_10, %c3_11, %c0_12, %c0_13] : memref<1x6x16x16xbf16, #tpu.memory_space<vmem>>, vector<1x1x16x16xbf16>
    %12 = vector.shape_cast %11 : vector<1x1x16x16xbf16> to vector<16x16xbf16>
    %13 = vector.shape_cast %1 : vector<16x16xbf16> to vector<1x1x16x16xbf16>
    tpu.vector_store %arg6[%c0_10, %c3_11, %c0_12, %c0_13], %13 {strides = array<i32>} : memref<1x6x16x16xbf16, #tpu.memory_space<vmem>>, vector<1x1x16x16xbf16>,
    %c0_14 = arith.constant 0 : index
    %c4 = arith.constant 4 : index
    %c0_15 = arith.constant 0 : index
    %c0_16 = arith.constant 0 : index
    %14 = vector.load %arg5[%c0_14, %c4, %c0_15, %c0_16] : memref<1x6x16x16xf32, #tpu.memory_space<vmem>>, vector<1x1x16x16xf32>
    %15 = vector.shape_cast %14 : vector<1x1x16x16xf32> to vector<16x16xf32>
    %16 = vector.shape_cast %0 : vector<16x16xf32> to vector<1x1x16x16xf32>
    tpu.vector_store %arg5[%c0_14, %c4, %c0_15, %c0_16], %16 {strides = array<i32>} : memref<1x6x16x16xf32, #tpu.memory_space<vmem>>, vector<1x1x16x16xf32>,
    %c0_17 = arith.constant 0 : index
    %c4_18 = arith.constant 4 : index
    %c0_19 = arith.constant 0 : index
    %c0_20 = arith.constant 0 : index
    %17 = vector.load %arg6[%c0_17, %c4_18, %c0_19, %c0_20] : memref<1x6x16x16xbf16, #tpu.memory_space<vmem>>, vector<1x1x16x16xbf16>
    %18 = vector.shape_cast %17 : vector<1x1x16x16xbf16> to vector<16x16xbf16>
    %19 = vector.shape_cast %1 : vector<16x16xbf16> to vector<1x1x16x16xbf16>
    tpu.vector_store %arg6[%c0_17, %c4_18, %c0_19, %c0_20], %19 {strides = array<i32>} : memref<1x6x16x16xbf16, #tpu.memory_space<vmem>>, vector<1x1x16x16xbf16>,
    %c0_21 = arith.constant 0 : index
    %c5 = arith.constant 5 : index
    %c0_22 = arith.constant 0 : index
    %c0_23 = arith.constant 0 : index
    %20 = vector.load %arg5[%c0_21, %c5, %c0_22, %c0_23] : memref<1x6x16x16xf32, #tpu.memory_space<vmem>>, vector<1x1x16x16xf32>
    %21 = vector.shape_cast %20 : vector<1x1x16x16xf32> to vector<16x16xf32>
    %22 = vector.shape_cast %0 : vector<16x16xf32> to vector<1x1x16x16xf32>
    tpu.vector_store %arg5[%c0_21, %c5, %c0_22, %c0_23], %22 {strides = array<i32>} : memref<1x6x16x16xf32, #tpu.memory_space<vmem>>, vector<1x1x16x16xf32>,
    %c0_24 = arith.constant 0 : index
    %c5_25 = arith.constant 5 : index
    %c0_26 = arith.constant 0 : index
    %c0_27 = arith.constant 0 : index
    %23 = vector.load %arg6[%c0_24, %c5_25, %c0_26, %c0_27] : memref<1x6x16x16xbf16, #tpu.memory_space<vmem>>, vector<1x1x16x16xbf16>
    %24 = vector.shape_cast %23 : vector<1x1x16x16xbf16> to vector<16x16xbf16>
    %25 = vector.shape_cast %1 : vector<16x16xbf16> to vector<1x1x16x16xbf16>
    tpu.vector_store %arg6[%c0_24, %c5_25, %c0_26, %c0_27], %25 {strides = array<i32>} : memref<1x6x16x16xbf16, #tpu.memory_space<vmem>>, vector<1x1x16x16xbf16>,
    %c0_28 = arith.constant 0 : index
    %c0_29 = arith.constant 0 : index
    %c0_30 = arith.constant 0 : index
    %26 = vector.load %arg1[%c0_28, %c0_29, %c0_30] : memref<1x16x16xf32, #tpu.memory_space<vmem>>, vector<1x16x16xf32>
    %27 = vector.shape_cast %26 : vector<1x16x16xf32> to vector<16x16xf32>
    %c0_31 = arith.constant 0 : index
    %c0_32 = arith.constant 0 : index
    %c0_33 = arith.constant 0 : index
    %28 = vector.load %arg2[%c0_31, %c0_32, %c0_33] : memref<1x16x16xf32, #tpu.memory_space<vmem>>, vector<1x16x16xf32>
    %29 = vector.shape_cast %28 : vector<1x16x16xf32> to vector<16x16xf32>
    %cst_34 = arith.constant 0.000000e+00 : f32
    %30 = vector.broadcast %cst_34 : f32 to vector<16x16xf32>
    %31 = arith.cmpf ogt, %29, %30 : vector<16x16xf32>
    %cst_35 = arith.constant 1.000000e+00 : f32
    %32 = vector.broadcast %cst_35 : f32 to vector<16x16xf32>
    %33 = arith.select %31, %29, %32 : vector<16x16xi1>, vector<16x16xf32>
    %34 = arith.divf %27, %33 : vector<16x16xf32>
    %cst_36 = arith.constant 1.000000e+00 : f32
    %cst_37 = arith.constant 0.000000e+00 : f32
    %35 = vector.broadcast %cst_36 : f32 to vector<16x16xf32>
    %36 = vector.broadcast %cst_37 : f32 to vector<16x16xf32>
    %37 = arith.select %31, %35, %36 : vector<16x16xi1>, vector<16x16xf32>
    %38 = tpu.iota {dimensions = array<i32: 1>} : vector<16x16xi32>
    %39 = tpu.iota {dimensions = array<i32: 0>} : vector<16x16xi32>
    %c1_i32 = arith.constant 1 : i32
    %40 = vector.broadcast %c1_i32 : i32 to vector<16x16xi32>
    %41 = arith.cmpi sge, %38, %40 : vector<16x16xi32>
    %42 = arith.extui %41 : vector<16x16xi1> to vector<16x16xi32>
    %43 = arith.sitofp %42 : vector<16x16xi32> to vector<16x16xf32>
    %c1_i32_38 = arith.constant 1 : i32
    %44 = vector.broadcast %c1_i32_38 : i32 to vector<16x16xi32>
    %45 = arith.cmpi sge, %39, %44 : vector<16x16xi32>
    %46 = arith.extui %45 : vector<16x16xi1> to vector<16x16xi32>
    %47 = arith.sitofp %46 : vector<16x16xi32> to vector<16x16xf32>
    %cst_39 = arith.constant 0.000000e+00 : f32
    %48 = vector.broadcast %cst_39 : f32 to vector<16x1xf32>
    %49 = vector.extract_strided_slice %34 {offsets = [0, 0], sizes = [16, 15], strides = [1, 1]} : vector<16x16xf32> to vector<16x15xf32>
    %50 = tpu.concatenate %48, %49 in 1 : vector<16x1xf32>, vector<16x15xf32> -> vector<16x16xf32>
    %51 = arith.subf %34, %50 : vector<16x16xf32>
    %52 = arith.mulf %51, %43 : vector<16x16xf32>
    %cst_40 = arith.constant 0.000000e+00 : f32
    %53 = vector.broadcast %cst_40 : f32 to vector<16x1xf32>
    %54 = vector.extract_strided_slice %37 {offsets = [0, 0], sizes = [16, 15], strides = [1, 1]} : vector<16x16xf32> to vector<16x15xf32>
    %55 = tpu.concatenate %53, %54 in 1 : vector<16x1xf32>, vector<16x15xf32> -> vector<16x16xf32>
    %56 = arith.mulf %37, %55 : vector<16x16xf32>
    %cst_41 = arith.constant 0.000000e+00 : f32
    %57 = vector.broadcast %cst_41 : f32 to vector<1x16xf32>
    %58 = vector.extract_strided_slice %34 {offsets = [0, 0], sizes = [15, 16], strides = [1, 1]} : vector<16x16xf32> to vector<15x16xf32>
    %59 = tpu.concatenate %57, %58 in 0 : vector<1x16xf32>, vector<15x16xf32> -> vector<16x16xf32>
    %60 = arith.subf %34, %59 : vector<16x16xf32>
    %61 = arith.mulf %60, %47 : vector<16x16xf32>
    %cst_42 = arith.constant 0.000000e+00 : f32
    %62 = vector.broadcast %cst_42 : f32 to vector<1x16xf32>
    %63 = vector.extract_strided_slice %37 {offsets = [0, 0], sizes = [15, 16], strides = [1, 1]} : vector<16x16xf32> to vector<15x16xf32>
    %64 = tpu.concatenate %62, %63 in 0 : vector<1x16xf32>, vector<15x16xf32> -> vector<16x16xf32>
    %65 = arith.mulf %37, %64 : vector<16x16xf32>
    %66 = vector.shape_cast %56 : vector<16x16xf32> to vector<1x16x16xf32>
    %cst_43 = arith.constant dense<0.000000e+00> : vector<1xf32>
    %67 = vector.multi_reduction <add>, %66, %cst_43 [1, 2] : vector<1x16x16xf32> to vector<1xf32>
    %68 = vector.shape_cast %67 : vector<1xf32> to vector<1x1x1xf32>
    %69 = vector.extract %68[0, 0, 0] : f32 from vector<1x1x1xf32>
    %cst_44 = arith.constant 0.000000e+00 : f32
    %70 = arith.addf %cst_44, %69 : f32
    %71 = vector.shape_cast %65 : vector<16x16xf32> to vector<1x16x16xf32>
    %cst_45 = arith.constant dense<0.000000e+00> : vector<1xf32>
    %72 = vector.multi_reduction <add>, %71, %cst_45 [1, 2] : vector<1x16x16xf32> to vector<1xf32>
    %73 = vector.shape_cast %72 : vector<1xf32> to vector<1x1x1xf32>
    %74 = vector.extract %73[0, 0, 0] : f32 from vector<1x1x1xf32>
    %75 = arith.addf %70, %74 : f32
    %c0_46 = arith.constant 0 : index
    %c0_47 = arith.constant 0 : index
    %c0_48 = arith.constant 0 : index
    %c0_49 = arith.constant 0 : index
    %76 = vector.load %arg5[%c0_46, %c0_47, %c0_48, %c0_49] : memref<1x6x16x16xf32, #tpu.memory_space<vmem>>, vector<1x1x16x16xf32>
    %77 = vector.shape_cast %76 : vector<1x1x16x16xf32> to vector<16x16xf32>
    %78 = vector.shape_cast %52 : vector<16x16xf32> to vector<1x1x16x16xf32>
    tpu.vector_store %arg5[%c0_46, %c0_47, %c0_48, %c0_49], %78 {strides = array<i32>} : memref<1x6x16x16xf32, #tpu.memory_space<vmem>>, vector<1x1x16x16xf32>,
    %79 = arith.truncf %56 : vector<16x16xf32> to vector<16x16xbf16>
    %c0_50 = arith.constant 0 : index
    %c0_51 = arith.constant 0 : index
    %c0_52 = arith.constant 0 : index
    %c0_53 = arith.constant 0 : index
    %80 = vector.load %arg6[%c0_50, %c0_51, %c0_52, %c0_53] : memref<1x6x16x16xbf16, #tpu.memory_space<vmem>>, vector<1x1x16x16xbf16>
    %81 = vector.shape_cast %80 : vector<1x1x16x16xbf16> to vector<16x16xbf16>
    %82 = vector.shape_cast %79 : vector<16x16xbf16> to vector<1x1x16x16xbf16>
    tpu.vector_store %arg6[%c0_50, %c0_51, %c0_52, %c0_53], %82 {strides = array<i32>} : memref<1x6x16x16xbf16, #tpu.memory_space<vmem>>, vector<1x1x16x16xbf16>,
    %c0_54 = arith.constant 0 : index
    %c1 = arith.constant 1 : index
    %c0_55 = arith.constant 0 : index
    %c0_56 = arith.constant 0 : index
    %83 = vector.load %arg5[%c0_54, %c1, %c0_55, %c0_56] : memref<1x6x16x16xf32, #tpu.memory_space<vmem>>, vector<1x1x16x16xf32>
    %84 = vector.shape_cast %83 : vector<1x1x16x16xf32> to vector<16x16xf32>
    %85 = vector.shape_cast %61 : vector<16x16xf32> to vector<1x1x16x16xf32>
    tpu.vector_store %arg5[%c0_54, %c1, %c0_55, %c0_56], %85 {strides = array<i32>} : memref<1x6x16x16xf32, #tpu.memory_space<vmem>>, vector<1x1x16x16xf32>,
    %86 = arith.truncf %65 : vector<16x16xf32> to vector<16x16xbf16>
    %c0_57 = arith.constant 0 : index
    %c1_58 = arith.constant 1 : index
    %c0_59 = arith.constant 0 : index
    %c0_60 = arith.constant 0 : index
    %87 = vector.load %arg6[%c0_57, %c1_58, %c0_59, %c0_60] : memref<1x6x16x16xbf16, #tpu.memory_space<vmem>>, vector<1x1x16x16xbf16>
    %88 = vector.shape_cast %87 : vector<1x1x16x16xbf16> to vector<16x16xbf16>
    %89 = vector.shape_cast %86 : vector<16x16xbf16> to vector<1x1x16x16xbf16>
    tpu.vector_store %arg6[%c0_57, %c1_58, %c0_59, %c0_60], %89 {strides = array<i32>} : memref<1x6x16x16xbf16, #tpu.memory_space<vmem>>, vector<1x1x16x16xbf16>,
    %c0_61 = arith.constant 0 : index
    %c0_62 = arith.constant 0 : index
    %90 = vector.load %arg3[%c0_61, %c0_62] : memref<8x16xf32, #tpu.memory_space<vmem>>, vector<8x16xf32>
    %c0_63 = arith.constant 0 : index
    %c0_64 = arith.constant 0 : index
    %91 = vector.load %arg4[%c0_63, %c0_64] : memref<16x8xf32, #tpu.memory_space<vmem>>, vector<16x8xf32>
    %cst_65 = arith.constant dense<0.000000e+00> : vector<8x16xf32>
    %92 = tpu.matmul %90, %27, %cst_65 {dimension_numbers = #tpu.dot_dimension_numbers<[1], [0], [0], [1], [0, 0, 1, 1], [], []>} : vector<8x16xf32>, vector<16x16xf32>, vector<8x16xf32> -> vector<8x16xf32>
    %cst_66 = arith.constant dense<0.000000e+00> : vector<8x8xf32>
    %93 = tpu.matmul %92, %91, %cst_66 {dimension_numbers = #tpu.dot_dimension_numbers<[1], [0], [0], [1], [0, 0, 1, 1], [], []>} : vector<8x16xf32>, vector<16x8xf32>, vector<8x8xf32> -> vector<8x8xf32>
    %94 = arith.truncf %90 : vector<8x16xf32> to vector<8x16xbf16>
    %95 = arith.truncf %29 : vector<16x16xf32> to vector<16x16xbf16>
    %cst_67 = arith.constant dense<0.000000e+00> : vector<8x16xf32>
    %96 = tpu.matmul %94, %95, %cst_67 {dimension_numbers = #tpu.dot_dimension_numbers<[1], [0], [0], [1], [0, 0, 1, 1], [], []>} : vector<8x16xbf16>, vector<16x16xbf16>, vector<8x16xf32> -> vector<8x16xf32>
    %97 = arith.truncf %96 : vector<8x16xf32> to vector<8x16xbf16>
    %98 = arith.truncf %91 : vector<16x8xf32> to vector<16x8xbf16>
    %cst_68 = arith.constant dense<0.000000e+00> : vector<8x8xf32>
    %99 = tpu.matmul %97, %98, %cst_68 {dimension_numbers = #tpu.dot_dimension_numbers<[1], [0], [0], [1], [0, 0, 1, 1], [], []>} : vector<8x16xbf16>, vector<16x8xbf16>, vector<8x8xf32> -> vector<8x8xf32>
    %cst_69 = arith.constant 0.000000e+00 : f32
    %100 = vector.broadcast %cst_69 : f32 to vector<8x8xf32>
    %101 = arith.cmpf ogt, %99, %100 : vector<8x8xf32>
    %cst_70 = arith.constant 4.000000e+00 : f32
    %102 = vector.broadcast %cst_70 : f32 to vector<8x8xf32>
    %103 = arith.select %101, %99, %102 : vector<8x8xi1>, vector<8x8xf32>
    %104 = arith.divf %93, %103 : vector<8x8xf32>
    %cst_71 = arith.constant 1.000000e+00 : f32
    %cst_72 = arith.constant 0.000000e+00 : f32
    %105 = vector.broadcast %cst_71 : f32 to vector<8x8xf32>
    %106 = vector.broadcast %cst_72 : f32 to vector<8x8xf32>
    %107 = arith.select %101, %105, %106 : vector<8x8xi1>, vector<8x8xf32>
    %108 = tpu.iota {dimensions = array<i32: 1>} : vector<8x8xi32>
    %109 = tpu.iota {dimensions = array<i32: 0>} : vector<8x8xi32>
    %c1_i32_73 = arith.constant 1 : i32
    %110 = vector.broadcast %c1_i32_73 : i32 to vector<8x8xi32>
    %111 = arith.cmpi sge, %108, %110 : vector<8x8xi32>
    %112 = arith.extui %111 : vector<8x8xi1> to vector<8x8xi32>
    %113 = arith.sitofp %112 : vector<8x8xi32> to vector<8x8xf32>
    %c1_i32_74 = arith.constant 1 : i32
    %114 = vector.broadcast %c1_i32_74 : i32 to vector<8x8xi32>
    %115 = arith.cmpi sge, %109, %114 : vector<8x8xi32>
    %116 = arith.extui %115 : vector<8x8xi1> to vector<8x8xi32>
    %117 = arith.sitofp %116 : vector<8x8xi32> to vector<8x8xf32>
    %cst_75 = arith.constant 0.000000e+00 : f32
    %118 = vector.broadcast %cst_75 : f32 to vector<8x1xf32>
    %119 = vector.extract_strided_slice %104 {offsets = [0, 0], sizes = [8, 7], strides = [1, 1]} : vector<8x8xf32> to vector<8x7xf32>
    %120 = tpu.concatenate %118, %119 in 1 : vector<8x1xf32>, vector<8x7xf32> -> vector<8x8xf32>
    %121 = arith.subf %104, %120 : vector<8x8xf32>
    %122 = arith.mulf %121, %113 : vector<8x8xf32>
    %cst_76 = arith.constant 0.000000e+00 : f32
    %123 = vector.broadcast %cst_76 : f32 to vector<8x1xf32>
    %124 = vector.extract_strided_slice %107 {offsets = [0, 0], sizes = [8, 7], strides = [1, 1]} : vector<8x8xf32> to vector<8x7xf32>
    %125 = tpu.concatenate %123, %124 in 1 : vector<8x1xf32>, vector<8x7xf32> -> vector<8x8xf32>
    %126 = arith.mulf %107, %125 : vector<8x8xf32>
    %cst_77 = arith.constant 0.000000e+00 : f32
    %127 = vector.broadcast %cst_77 : f32 to vector<1x8xf32>
    %128 = vector.extract_strided_slice %104 {offsets = [0, 0], sizes = [7, 8], strides = [1, 1]} : vector<8x8xf32> to vector<7x8xf32>
    %129 = tpu.concatenate %127, %128 in 0 : vector<1x8xf32>, vector<7x8xf32> -> vector<8x8xf32>
    %130 = arith.subf %104, %129 : vector<8x8xf32>
    %131 = arith.mulf %130, %117 : vector<8x8xf32>
    %cst_78 = arith.constant 0.000000e+00 : f32
    %132 = vector.broadcast %cst_78 : f32 to vector<1x8xf32>
    %133 = vector.extract_strided_slice %107 {offsets = [0, 0], sizes = [7, 8], strides = [1, 1]} : vector<8x8xf32> to vector<7x8xf32>
    %134 = tpu.concatenate %132, %133 in 0 : vector<1x8xf32>, vector<7x8xf32> -> vector<8x8xf32>
    %135 = arith.mulf %107, %134 : vector<8x8xf32>
    %136 = vector.shape_cast %126 : vector<8x8xf32> to vector<1x8x8xf32>
    %cst_79 = arith.constant dense<0.000000e+00> : vector<1xf32>
    %137 = vector.multi_reduction <add>, %136, %cst_79 [1, 2] : vector<1x8x8xf32> to vector<1xf32>
    %138 = vector.shape_cast %137 : vector<1xf32> to vector<1x1x1xf32>
    %139 = vector.extract %138[0, 0, 0] : f32 from vector<1x1x1xf32>
    %140 = arith.addf %75, %139 : f32
    %141 = vector.shape_cast %135 : vector<8x8xf32> to vector<1x8x8xf32>
    %cst_80 = arith.constant dense<0.000000e+00> : vector<1xf32>
    %142 = vector.multi_reduction <add>, %141, %cst_80 [1, 2] : vector<1x8x8xf32> to vector<1xf32>
    %143 = vector.shape_cast %142 : vector<1xf32> to vector<1x1x1xf32>
    %144 = vector.extract %143[0, 0, 0] : f32 from vector<1x1x1xf32>
    %145 = arith.addf %140, %144 : f32
    %c0_81 = arith.constant 0 : index
    %c2_82 = arith.constant 2 : index
    %c0_83 = arith.constant 0 : index
    %c0_84 = arith.constant 0 : index
    %146 = vector.load %arg5[%c0_81, %c2_82, %c0_83, %c0_84] : memref<1x6x16x16xf32, #tpu.memory_space<vmem>>, vector<1x1x8x8xf32>
    %147 = vector.shape_cast %146 : vector<1x1x8x8xf32> to vector<8x8xf32>
    %148 = vector.shape_cast %122 : vector<8x8xf32> to vector<1x1x8x8xf32>
    tpu.vector_store %arg5[%c0_81, %c2_82, %c0_83, %c0_84], %148 {strides = array<i32>} : memref<1x6x16x16xf32, #tpu.memory_space<vmem>>, vector<1x1x8x8xf32>,
    %149 = arith.truncf %126 : vector<8x8xf32> to vector<8x8xbf16>
    %c0_85 = arith.constant 0 : index
    %c2_86 = arith.constant 2 : index
    %c0_87 = arith.constant 0 : index
    %c0_88 = arith.constant 0 : index
    %150 = vector.load %arg6[%c0_85, %c2_86, %c0_87, %c0_88] : memref<1x6x16x16xbf16, #tpu.memory_space<vmem>>, vector<1x1x8x8xbf16>
    %151 = vector.shape_cast %150 : vector<1x1x8x8xbf16> to vector<8x8xbf16>
    %152 = vector.shape_cast %149 : vector<8x8xbf16> to vector<1x1x8x8xbf16>
    tpu.vector_store %arg6[%c0_85, %c2_86, %c0_87, %c0_88], %152 {strides = array<i32>} : memref<1x6x16x16xbf16, #tpu.memory_space<vmem>>, vector<1x1x8x8xbf16>,
    %c0_89 = arith.constant 0 : index
    %c3_90 = arith.constant 3 : index
    %c0_91 = arith.constant 0 : index
    %c0_92 = arith.constant 0 : index
    %153 = vector.load %arg5[%c0_89, %c3_90, %c0_91, %c0_92] : memref<1x6x16x16xf32, #tpu.memory_space<vmem>>, vector<1x1x8x8xf32>
    %154 = vector.shape_cast %153 : vector<1x1x8x8xf32> to vector<8x8xf32>
    %155 = vector.shape_cast %131 : vector<8x8xf32> to vector<1x1x8x8xf32>
    tpu.vector_store %arg5[%c0_89, %c3_90, %c0_91, %c0_92], %155 {strides = array<i32>} : memref<1x6x16x16xf32, #tpu.memory_space<vmem>>, vector<1x1x8x8xf32>,
    %156 = arith.truncf %135 : vector<8x8xf32> to vector<8x8xbf16>
    %c0_93 = arith.constant 0 : index
    %c3_94 = arith.constant 3 : index
    %c0_95 = arith.constant 0 : index
    %c0_96 = arith.constant 0 : index
    %157 = vector.load %arg6[%c0_93, %c3_94, %c0_95, %c0_96] : memref<1x6x16x16xbf16, #tpu.memory_space<vmem>>, vector<1x1x8x8xbf16>
    %158 = vector.shape_cast %157 : vector<1x1x8x8xbf16> to vector<8x8xbf16>
    %159 = vector.shape_cast %156 : vector<8x8xbf16> to vector<1x1x8x8xbf16>
    tpu.vector_store %arg6[%c0_93, %c3_94, %c0_95, %c0_96], %159 {strides = array<i32>} : memref<1x6x16x16xbf16, #tpu.memory_space<vmem>>, vector<1x1x8x8xbf16>,
    %c0_97 = arith.constant 0 : index
    %c0_98 = arith.constant 0 : index
    %160 = vector.load %arg3[%c0_97, %c0_98] : memref<8x16xf32, #tpu.memory_space<vmem>>, vector<4x8xf32>
    %c0_99 = arith.constant 0 : index
    %c0_100 = arith.constant 0 : index
    %161 = vector.load %arg4[%c0_99, %c0_100] : memref<16x8xf32, #tpu.memory_space<vmem>>, vector<8x4xf32>
    %cst_101 = arith.constant dense<0.000000e+00> : vector<4x8xf32>
    %162 = tpu.matmul %160, %93, %cst_101 {dimension_numbers = #tpu.dot_dimension_numbers<[1], [0], [0], [1], [0, 0, 1, 1], [], []>} : vector<4x8xf32>, vector<8x8xf32>, vector<4x8xf32> -> vector<4x8xf32>
    %cst_102 = arith.constant dense<0.000000e+00> : vector<4x4xf32>
    %163 = tpu.matmul %162, %161, %cst_102 {dimension_numbers = #tpu.dot_dimension_numbers<[1], [0], [0], [1], [0, 0, 1, 1], [], []>} : vector<4x8xf32>, vector<8x4xf32>, vector<4x4xf32> -> vector<4x4xf32>
    %164 = arith.truncf %160 : vector<4x8xf32> to vector<4x8xbf16>
    %165 = arith.truncf %99 : vector<8x8xf32> to vector<8x8xbf16>
    %cst_103 = arith.constant dense<0.000000e+00> : vector<4x8xf32>
    %166 = tpu.matmul %164, %165, %cst_103 {dimension_numbers = #tpu.dot_dimension_numbers<[1], [0], [0], [1], [0, 0, 1, 1], [], []>} : vector<4x8xbf16>, vector<8x8xbf16>, vector<4x8xf32> -> vector<4x8xf32>
    %167 = arith.truncf %166 : vector<4x8xf32> to vector<4x8xbf16>
    %168 = arith.truncf %161 : vector<8x4xf32> to vector<8x4xbf16>
    %cst_104 = arith.constant dense<0.000000e+00> : vector<4x4xf32>
    %169 = tpu.matmul %167, %168, %cst_104 {dimension_numbers = #tpu.dot_dimension_numbers<[1], [0], [0], [1], [0, 0, 1, 1], [], []>} : vector<4x8xbf16>, vector<8x4xbf16>, vector<4x4xf32> -> vector<4x4xf32>
    %cst_105 = arith.constant 0.000000e+00 : f32
    %170 = vector.broadcast %cst_105 : f32 to vector<4x4xf32>
    %171 = arith.cmpf ogt, %169, %170 : vector<4x4xf32>
    %cst_106 = arith.constant 1.600000e+01 : f32
    %172 = vector.broadcast %cst_106 : f32 to vector<4x4xf32>
    %173 = arith.select %171, %169, %172 : vector<4x4xi1>, vector<4x4xf32>
    %174 = arith.divf %163, %173 : vector<4x4xf32>
    %cst_107 = arith.constant 1.000000e+00 : f32
    %cst_108 = arith.constant 0.000000e+00 : f32
    %175 = vector.broadcast %cst_107 : f32 to vector<4x4xf32>
    %176 = vector.broadcast %cst_108 : f32 to vector<4x4xf32>
    %177 = arith.select %171, %175, %176 : vector<4x4xi1>, vector<4x4xf32>
    %178 = tpu.iota {dimensions = array<i32: 1>} : vector<4x4xi32>
    %179 = tpu.iota {dimensions = array<i32: 0>} : vector<4x4xi32>
    %c1_i32_109 = arith.constant 1 : i32
    %180 = vector.broadcast %c1_i32_109 : i32 to vector<4x4xi32>
    %181 = arith.cmpi sge, %178, %180 : vector<4x4xi32>
    %182 = arith.extui %181 : vector<4x4xi1> to vector<4x4xi32>
    %183 = arith.sitofp %182 : vector<4x4xi32> to vector<4x4xf32>
    %c1_i32_110 = arith.constant 1 : i32
    %184 = vector.broadcast %c1_i32_110 : i32 to vector<4x4xi32>
    %185 = arith.cmpi sge, %179, %184 : vector<4x4xi32>
    %186 = arith.extui %185 : vector<4x4xi1> to vector<4x4xi32>
    %187 = arith.sitofp %186 : vector<4x4xi32> to vector<4x4xf32>
    %cst_111 = arith.constant 0.000000e+00 : f32
    %188 = vector.broadcast %cst_111 : f32 to vector<4x1xf32>
    %189 = vector.extract_strided_slice %174 {offsets = [0, 0], sizes = [4, 3], strides = [1, 1]} : vector<4x4xf32> to vector<4x3xf32>
    %190 = tpu.concatenate %188, %189 in 1 : vector<4x1xf32>, vector<4x3xf32> -> vector<4x4xf32>
    %191 = arith.subf %174, %190 : vector<4x4xf32>
    %192 = arith.mulf %191, %183 : vector<4x4xf32>
    %cst_112 = arith.constant 0.000000e+00 : f32
    %193 = vector.broadcast %cst_112 : f32 to vector<4x1xf32>
    %194 = vector.extract_strided_slice %177 {offsets = [0, 0], sizes = [4, 3], strides = [1, 1]} : vector<4x4xf32> to vector<4x3xf32>
    %195 = tpu.concatenate %193, %194 in 1 : vector<4x1xf32>, vector<4x3xf32> -> vector<4x4xf32>
    %196 = arith.mulf %177, %195 : vector<4x4xf32>
    %cst_113 = arith.constant 0.000000e+00 : f32
    %197 = vector.broadcast %cst_113 : f32 to vector<1x4xf32>
    %198 = vector.extract_strided_slice %174 {offsets = [0, 0], sizes = [3, 4], strides = [1, 1]} : vector<4x4xf32> to vector<3x4xf32>
    %199 = tpu.concatenate %197, %198 in 0 : vector<1x4xf32>, vector<3x4xf32> -> vector<4x4xf32>
    %200 = arith.subf %174, %199 : vector<4x4xf32>
    %201 = arith.mulf %200, %187 : vector<4x4xf32>
    %cst_114 = arith.constant 0.000000e+00 : f32
    %202 = vector.broadcast %cst_114 : f32 to vector<1x4xf32>
    %203 = vector.extract_strided_slice %177 {offsets = [0, 0], sizes = [3, 4], strides = [1, 1]} : vector<4x4xf32> to vector<3x4xf32>
    %204 = tpu.concatenate %202, %203 in 0 : vector<1x4xf32>, vector<3x4xf32> -> vector<4x4xf32>
    %205 = arith.mulf %177, %204 : vector<4x4xf32>
    %206 = vector.shape_cast %196 : vector<4x4xf32> to vector<1x4x4xf32>
    %cst_115 = arith.constant dense<0.000000e+00> : vector<1xf32>
    %207 = vector.multi_reduction <add>, %206, %cst_115 [1, 2] : vector<1x4x4xf32> to vector<1xf32>
    %208 = vector.shape_cast %207 : vector<1xf32> to vector<1x1x1xf32>
    %209 = vector.extract %208[0, 0, 0] : f32 from vector<1x1x1xf32>
    %210 = arith.addf %145, %209 : f32
    %211 = vector.shape_cast %205 : vector<4x4xf32> to vector<1x4x4xf32>
    %cst_116 = arith.constant dense<0.000000e+00> : vector<1xf32>
    %212 = vector.multi_reduction <add>, %211, %cst_116 [1, 2] : vector<1x4x4xf32> to vector<1xf32>
    %213 = vector.shape_cast %212 : vector<1xf32> to vector<1x1x1xf32>
    %214 = vector.extract %213[0, 0, 0] : f32 from vector<1x1x1xf32>
    %215 = arith.addf %210, %214 : f32
    %c0_117 = arith.constant 0 : index
    %c4_118 = arith.constant 4 : index
    %c0_119 = arith.constant 0 : index
    %c0_120 = arith.constant 0 : index
    %216 = vector.load %arg5[%c0_117, %c4_118, %c0_119, %c0_120] : memref<1x6x16x16xf32, #tpu.memory_space<vmem>>, vector<1x1x4x4xf32>
    %217 = vector.shape_cast %216 : vector<1x1x4x4xf32> to vector<4x4xf32>
    %218 = vector.shape_cast %192 : vector<4x4xf32> to vector<1x1x4x4xf32>
    tpu.vector_store %arg5[%c0_117, %c4_118, %c0_119, %c0_120], %218 {strides = array<i32>} : memref<1x6x16x16xf32, #tpu.memory_space<vmem>>, vector<1x1x4x4xf32>,
    %219 = arith.truncf %196 : vector<4x4xf32> to vector<4x4xbf16>
    %c0_121 = arith.constant 0 : index
    %c4_122 = arith.constant 4 : index
    %c0_123 = arith.constant 0 : index
    %c0_124 = arith.constant 0 : index
    %220 = vector.load %arg6[%c0_121, %c4_122, %c0_123, %c0_124] : memref<1x6x16x16xbf16, #tpu.memory_space<vmem>>, vector<1x1x4x4xbf16>
    %221 = vector.shape_cast %220 : vector<1x1x4x4xbf16> to vector<4x4xbf16>
    %222 = vector.shape_cast %219 : vector<4x4xbf16> to vector<1x1x4x4xbf16>
    tpu.vector_store %arg6[%c0_121, %c4_122, %c0_123, %c0_124], %222 {strides = array<i32>} : memref<1x6x16x16xbf16, #tpu.memory_space<vmem>>, vector<1x1x4x4xbf16>,
    %c0_125 = arith.constant 0 : index
    %c5_126 = arith.constant 5 : index
    %c0_127 = arith.constant 0 : index
    %c0_128 = arith.constant 0 : index
    %223 = vector.load %arg5[%c0_125, %c5_126, %c0_127, %c0_128] : memref<1x6x16x16xf32, #tpu.memory_space<vmem>>, vector<1x1x4x4xf32>
    %224 = vector.shape_cast %223 : vector<1x1x4x4xf32> to vector<4x4xf32>
    %225 = vector.shape_cast %201 : vector<4x4xf32> to vector<1x1x4x4xf32>
    tpu.vector_store %arg5[%c0_125, %c5_126, %c0_127, %c0_128], %225 {strides = array<i32>} : memref<1x6x16x16xf32, #tpu.memory_space<vmem>>, vector<1x1x4x4xf32>,
    %226 = arith.truncf %205 : vector<4x4xf32> to vector<4x4xbf16>
    %c0_129 = arith.constant 0 : index
    %c5_130 = arith.constant 5 : index
    %c0_131 = arith.constant 0 : index
    %c0_132 = arith.constant 0 : index
    %227 = vector.load %arg6[%c0_129, %c5_130, %c0_131, %c0_132] : memref<1x6x16x16xbf16, #tpu.memory_space<vmem>>, vector<1x1x4x4xbf16>
    %228 = vector.shape_cast %227 : vector<1x1x4x4xbf16> to vector<4x4xbf16>
    %229 = vector.shape_cast %226 : vector<4x4xbf16> to vector<1x1x4x4xbf16>
    tpu.vector_store %arg6[%c0_129, %c5_130, %c0_131, %c0_132], %229 {strides = array<i32>} : memref<1x6x16x16xbf16, #tpu.memory_space<vmem>>, vector<1x1x4x4xbf16>,
    %230 = vector.broadcast %215 : f32 to vector<1x128xf32>
    %c0_133 = arith.constant 0 : index
    %c0_134 = arith.constant 0 : index
    %c0_135 = arith.constant 0 : index
    %231 = vector.load %arg7[%c0_133, %c0_134, %c0_135] : memref<1x1x128xf32, #tpu.memory_space<vmem>>, vector<1x1x128xf32>
    %232 = vector.shape_cast %231 : vector<1x1x128xf32> to vector<1x128xf32>
    %233 = vector.shape_cast %230 : vector<1x128xf32> to vector<1x1x128xf32>
    tpu.vector_store %arg7[%c0_133, %c0_134, %c0_135], %233 {strides = array<i32>} : memref<1x1x128xf32, #tpu.memory_space<vmem>>, vector<1x1x128xf32>,
    return
  }
  func.func @transform_0(%arg0: i32) -> (i32, i32, i32) {
    %c0_i32 = arith.constant 0 : i32
    %c0_i32_0 = arith.constant 0 : i32
    %c0_i32_1 = arith.constant 0 : i32
    return %arg0, %c0_i32, %c0_i32_0 : i32, i32, i32
  }
  func.func @transform_1(%arg0: i32) -> (i32, i32, i32) {
    %c0_i32 = arith.constant 0 : i32
    %c0_i32_0 = arith.constant 0 : i32
    %c0_i32_1 = arith.constant 0 : i32
    return %arg0, %c0_i32, %c0_i32_0 : i32, i32, i32
  }
  func.func @transform_2(%arg0: i32) -> (i32, i32) {
    %c0_i32 = arith.constant 0 : i32
    %c0_i32_0 = arith.constant 0 : i32
    %c0_i32_1 = arith.constant 0 : i32
    return %c0_i32, %c0_i32_0 : i32, i32
  }
  func.func @transform_3(%arg0: i32) -> (i32, i32) {
    %c0_i32 = arith.constant 0 : i32
    %c0_i32_0 = arith.constant 0 : i32
    %c0_i32_1 = arith.constant 0 : i32
    return %c0_i32, %c0_i32_0 : i32, i32
  }
  func.func @transform_4(%arg0: i32) -> (i32, i32, i32, i32) {
    %c0_i32 = arith.constant 0 : i32
    %c0_i32_0 = arith.constant 0 : i32
    %c0_i32_1 = arith.constant 0 : i32
    %c0_i32_2 = arith.constant 0 : i32
    return %arg0, %c0_i32, %c0_i32_0, %c0_i32_1 : i32, i32, i32, i32
  }
  func.func @transform_5(%arg0: i32) -> (i32, i32, i32, i32) {
    %c0_i32 = arith.constant 0 : i32
    %c0_i32_0 = arith.constant 0 : i32
    %c0_i32_1 = arith.constant 0 : i32
    %c0_i32_2 = arith.constant 0 : i32
    return %arg0, %c0_i32, %c0_i32_0, %c0_i32_1 : i32, i32, i32, i32
  }
  func.func @transform_6(%arg0: i32) -> (i32, i32, i32) {
    %c0_i32 = arith.constant 0 : i32
    %c0_i32_0 = arith.constant 0 : i32
    %c0_i32_1 = arith.constant 0 : i32
    return %arg0, %c0_i32, %c0_i32_0 : i32, i32, i32
  }
}

</mosaic_0001>

<bundles_post_ra>
// kernel: tpu_custom_call.1
= control target key start
LH: loop header
LB: loop body
LE: loop exit
PB: predicated region body
PF: predicated region fallthrough
CT: control target
= control target key end

     0   :  { %s2254_s0 = inlined_call_operand.hbm [shape: f32[2,16,16], index: 0, kind: input, shape index: {}]   ;;  %s2255_s1 = inlined_call_operand.hbm [shape: f32[2,16,16], index: 1, kind: input, shape index: {}]   ;;  %s2256_s2 = inlined_call_operand.vmem [shape: f32[8,16], index: 2, kind: input, shape index: {}]   ;;  %s2257_s3 = inlined_call_operand.vmem [shape: f32[16,8], index: 3, kind: input, shape index: {}]   ;;  %s2258_s4 = inlined_call_operand.hbm [shape: f32[2,6,16,16], index: 4, kind: output, shape index: {0}]   ;;  %s2259_s5 = inlined_call_operand.hbm [shape: bf16[2,6,16,16], index: 5, kind: output, shape index: {1}]   ;;  %s2260_s6 = inlined_call_operand.hbm [shape: f32[2,1,128], index: 6, kind: output, shape index: {2}]  }
   0x1   :  { %2267 = sst [smem:[#allocation17_spill]] %s2254_s0 }
   0x2   :  { %2268 = sst [smem:[#allocation18_spill]] %s2255_s1 }
   0x3   :  { %2269 = sst [smem:[#allocation19_spill]] %s2256_s2 }
   0x4   :  { %2270 = sst [smem:[#allocation20_spill]] %s2257_s3 }
   0x5   :  { %2271 = sst [smem:[#allocation21_spill]] %s2258_s4 }
   0x6   :  { %2272 = sst [smem:[#allocation22_spill]] %s2259_s5 }
   0x7   :  { %12 = vsyncpa [#allocation3], 0 }
   0x8   :  { %14 = vsyncpa [#allocation3 + $0x1], 0 }
   0x9   :  { %15 = vsyncpa [#allocation6], 0 }
   0xa   :  { %17 = vsyncpa [#allocation6 + $0x1], 0 }
   0xb   :  { %18 = vsyncpa [#allocation4], 0 }
   0xc   :  { %20 = vsyncpa [#allocation4 + $0x1], 0 }
   0xd   :  { %21 = vsyncpa [#allocation9], 0 }
   0xe   :  { %23 = vsyncpa [#allocation9 + $0x1], 0  ;;  %s1748_s21 = smov 0   ;;  %s1750_s22 = smov 0  }
   0xf   :  { %s1752_s23 = smov 0   ;;  %s1754_s24 = smov 0  }
  0x10 LB: > { %2273 = sst [smem:[#allocation15_spill]] %s1692_s23  ;;  %s1769_s25 = sadd.s32 4294967295, %s1696_s24   ;;  %s1696_s24 = sphi %s1754_s24, %s2298_s24   ;;  %s1692_s23 = sphi %s1752_s23, %s2295_s23   ;;  %s1688_s22 = sphi %s1750_s22, %s2297_s22   ;;  %s1684_s21 = sphi %s1748_s21, %s2296_s21  }
  0x11   : > { %s2261_s26 = sadd.s32 4294967294, %s1696_s24   ;;  %s1773_s27 = sadd.s32 1, %s1696_s24  }
  0x12   : > { %s36_s28 = sadd.s32 1, %s1692_s23  ;;  %s33_s29 = ssub.s32 %s1696_s24, %s1773_s27 }
  0x13   : > { %p43_p0 = scmp.ne.s32.totalorder %s1692_s23, %s1688_s22  ;;  %p34_p1 = scmp.eq.s32.totalorder %s33_s29, 0 }
  0x14   : > { %p44_p2 = scmp.eq.s32.totalorder %s1696_s24, 0  ;;  %p49_p3 = scmp.ne.s32.totalorder %s1688_s22, %s1684_s21 }
  0x15   : > { %p50_p4 = scmp.eq.s32.totalorder %s1769_s25, 0  ;;  %p141_p7 = scmp.eq.s32.totalorder %s1769_s25, 1 }
  0x16   : > { %s1785_s30 = scalar_select %p34_p1, %s1692_s23, %s36_s28  }
  0x17   : > { %p1787_p5 = por %p44_p2, %p43_p0  ;;  %p1791_p6 = por %p50_p4, %p49_p3 }
  0x18   : > { %2274 = sst [smem:[#allocation16_spill]] %s1785_s30  ;;  %p147_p8 = scmp.eq.s32.totalorder %s2261_s26, 1 }
  0x19   : > { %s2276_s8 = scalar_select %p1791_p6, 1, 0 }
  0x1a   : > { %p1459_p10 = scmp.lt.s32.totalorder %s1696_s24, 2  ;;  %p1800_p11 = por %p141_p7, %p43_p0 }
  0x1b   : > { %p1804_p12 = por %p147_p8, %p49_p3  ;;  %s1809_s11 = sand.u32 1, %s1692_s23  }
  0x1c   : > { %s2277_s9 = scalar_select %p1800_p11, 1, 0 }
  0x1d   : > { %s2278_s10 = scalar_select %p1804_p12, 1, 0 }
  0x1e   : > { %s1344_s12 = sshll.u32 %s1696_s24, 8  ;;  %s2262_s13 = sshll.u32 %s1809_s11, 4 }
  0x1f   : > { %s2279_s0 = sld [smem:[#allocation17_spill]]  ;;  %s229_s17 = scalar_lea.vmem [#allocation2], %s2262_s13 }
  0x20   : > { %s236_s18 = sshll.u32 %s229_s17, 4  ;;  %p1824_p13 = pnand %p1459_p10, %p1787_p5  ;;  %s1828_s18 = int_to_ptr.vmem [resolvable:$true] %s236_s18 }
  0x21   : > { %s226_s20 = scalar_lea.sflag [#allocation3], %s1809_s11 }
  0x22   : > { %p1518_p1 = pneg %p1824_p13 }
  0x25   : > { %s1818_s16 = scalar_lea.hbm %s2279_s0, %s1344_s12  ;;  %s1521_s7 = scalar_lea.hbm %s2279_s0, 512 }
  0x26   : > { %s1516_s28 = scalar_lea.hbm %s1818_s16, 256  ;;  %p1522_p4 = scmp.lt.s32.totalorder %s1818_s16, %s2279_s0 }
  0x27   : > { %p1517_p0 = scmp.ne.s32.totalorder %s1818_s16, %s1516_s28  ;;  %p1523_p5 = scmp.lt.s32.totalorder %s1521_s7, %s1516_s28 }
  0x29   : > { %p1519_p2 = pnand %p1518_p1, %p1517_p0  ;;  %p1524_p7 = por %p1523_p5, %p1522_p4 }
  0x2b   : > { %p1520_p3 = pneg %p1519_p2 }
  0x2d   : > { %p1525_p8 = pnand %p1524_p7, %p1520_p3 }
  0x2f   : > { %1528 = shalt.err (!%p1525_p8)
}
  0x30   : > { %s1529_s26 = scalar_lea.vmem %s1828_s18, 256  ;;  %s1698_s29 = smov [#allocation2]  }
  0x31   : > { %p1530_p10 = scmp.ne.s32.totalorder %s1828_s18, %s1529_s26  ;;  %s1534_s14 = sshll.u32 %s1698_s29, 4  ;;  %s1535_s14 = int_to_ptr.vmem [resolvable:$false] %s1534_s14 }
  0x32   : > { %s1536_s13 = scalar_lea.vmem %s1535_s14, 512  ;;  %p1537_p9 = scmp.lt.s32.totalorder %s1828_s18, %s1535_s14 }
  0x33   : > { %p1532_p0 = pnand %p1530_p10, %p1518_p1  ;;  %p1538_p12 = scmp.lt.s32.totalorder %s1536_s13, %s1529_s26 }
  0x35   : > { %p1533_p2 = pneg %p1532_p0  ;;  %p1539_p11 = por %p1538_p12, %p1537_p9 }
  0x37   : > { %p1540_p4 = pnand %p1539_p11, %p1533_p2 }
  0x39   : > { %1543 = shalt.err (!%p1540_p4)
}
  0x3a   : > { %s2264_s28 = smov 128   ;;  %s1700_s7 = smov 8  }
  0x3b   : > { %1445 = dma.hbm_to_vmem [thread:$0]  (!%p1824_p13), %s1818_s16, 256, %s1828_s18, %s226_s20, %s2264_s28, %s2264_s28, %s1700_s7  }
  0x3c   : > { %p1294_p9 = scmp.ge.s32.totalorder %s1696_s24, 1  ;;  %p265_p11 = scmp.lt.s32.totalorder %s1696_s24, 3 }
  0x3d   : > { %s2282_s1 = sld [smem:[#allocation18_spill]]  ;;  %s2283_s29 = sshll.u32 %s1809_s11, 4 }
  0x3e   : > { %p1862_p12 = pnand %p1294_p9, %p265_p11  ;;  %s250_s14 = scalar_lea.vmem [#allocation5], %s2283_s29 }
  0x3f   : > { %s257_s0 = sshll.u32 %s250_s14, 4  ;;  %s247_s16 = scalar_lea.sflag [#allocation6], %s1809_s11  ;;  %s1875_s0 = int_to_ptr.vmem [resolvable:$true] %s257_s0 }
  0x43   : > { %s1871_s17 = scalar_lea.hbm %s2282_s1, %s1344_s12  ;;  %s1549_s12 = scalar_lea.hbm %s2282_s1, 512 }
  0x44   : > { %s1544_s18 = scalar_lea.hbm %s1871_s17, 256  ;;  %p1550_p8 = scmp.lt.s32.totalorder %s1871_s17, %s2282_s1 }
  0x45   : > { %p1545_p3 = scmp.ne.s32.totalorder %s1871_s17, %s1544_s18  ;;  %p1551_p10 = scmp.lt.s32.totalorder %s1549_s12, %s1544_s18 }
  0x47   : > { %p1547_p5 = pnand %p1545_p3, %p1518_p1  ;;  %p1552_p0 = por %p1551_p10, %p1550_p8 }
  0x49   : > { %p1548_p7 = pneg %p1547_p5 }
  0x4b   : > { %p1553_p2 = pnand %p1552_p0, %p1548_p7 }
  0x4d   : > { %1556 = shalt.err (!%p1553_p2)
}
  0x4e   : > { %s1557_s11 = scalar_lea.vmem %s1875_s0, 256  ;;  %s1701_s28 = smov [#allocation5]  }
  0x4f   : > { %p1558_p4 = scmp.ne.s32.totalorder %s1875_s0, %s1557_s11  ;;  %s1562_s29 = sshll.u32 %s1701_s28, 4  ;;  %s1563_s29 = int_to_ptr.vmem [resolvable:$false] %s1562_s29 }
  0x50   : > { %s1564_s14 = scalar_lea.vmem %s1563_s29, 512  ;;  %p1565_p3 = scmp.lt.s32.totalorder %s1875_s0, %s1563_s29 }
  0x51   : > { %p1560_p9 = pnand %p1558_p4, %p1518_p1  ;;  %p1566_p5 = scmp.lt.s32.totalorder %s1564_s14, %s1557_s11 }
  0x53   : > { %p1561_p11 = pneg %p1560_p9  ;;  %p1567_p6 = por %p1566_p5, %p1565_p3 }
  0x55   : > { %p1568_p8 = pnand %p1567_p6, %p1561_p11 }
  0x57   : > { %1571 = shalt.err (!%p1568_p8)
}
  0x58   : > { %s2284_s18 = smov 128   ;;  %269 = sbr.rel (%p1862_p12) target bundleno = 1229 (0x4cd), region = 36 }
  0x59   : > { %1448 = dma.hbm_to_vmem [thread:$0]  (!%p1824_p13), %s1871_s17, 256, %s1875_s0, %s247_s16, %s2284_s18, %s2284_s18, %s1700_s7  }
  0x5a   : > { %s1906_s20 = sand.u32 (!%p1862_p12), 1, %s1688_s22   ;;  %p2285_p6 = scmp.ne.s32.totalorder (!%p1862_p12), %s2276_s8, 0 }
  0x5b   : > { %s1295_s12 = sshll.u32 (!%p1862_p12), %s1906_s20, 4  ;;  %s272_s13 = scalar_lea.sflag (!%p1862_p12), [#allocation3], %s1906_s20 }
  0x5c   : > { %s275_s15 = scalar_lea.vmem (!%p1862_p12), [#allocation2], %s1295_s12 }
  0x5d   : > { %1667 = dma.done.wait (%p2285_p6), %s272_s13, 256  }
  0x5e   : > { %1669 = vsyncadd (%p2285_p6), %s272_s13, 4294967040  ;;  %s281_s0 = scalar_lea.sflag [#allocation6], %s1906_s20  ;;  %s284_s19 = scalar_lea.vmem [#allocation5], %s1295_s12 }
  0x5f   : > { %1671 = dma.done.wait (%p2285_p6), %s281_s0, 256  }
  0x60   : > { %1673 = vsyncadd (%p2285_p6), %s281_s0, 4294967040  ;;  %s1416_s7 = smul.u32 96, %s1906_s20  ;;  %v1702_v0 = vmov 0.0   ;;  %vm1703_vm0 = vmmov 0   ;;  %vm329_vm1 = vcmask 130048   ;;  %v355_v1 = vld [vmem:[%s275_s15 + $0x8] sm:$0xff]  ;;  %v368_v56 = vlaneseq }
  0x61   : > { %1368 = vmatprep.subr.mxu0 %v1702_v0  ;;  %1372 = vmatprep.mubr.msk.f32.mxu0 %vm1703_vm0, %v1702_v0  ;;  %v357_v2 = vld [vmem:[%s284_s19 + $0x8] sm:$0xff]  ;;  %v354_v3 = vld [vmem:[%s275_s15] sm:$0xff]  ;;  %s2286_s2 = sld [smem:[#allocation19_spill]]  ;;  %vm409_vm4 = vcmask 1040384   ;;  %s1704_s14 = smov 1   ;;  %vm333_vm5 = vcmask 125952  }
  0x62   : > { %1375 = vmatprep.subr.mxu1 %v1702_v0  ;;  %1379 = vmatprep.mubr.msk.f32.mxu1 %vm1703_vm0, %v1702_v0  ;;  %s1926_s26 = scalar_lea.vmem [#allocation7], %s1416_s7  ;;  %vm359_vm2 = vcmp.gt.f32.partialorder %v357_v2, 0.0  ;;  %v356_v4 = vld [vmem:[%s284_s19] sm:$0xff]  ;;  %s2287_s3 = sld [smem:[#allocation20_spill]]  ;;  %v1705_v31 = vmov 0   ;;  %vm746_vm6 = vcmask 64512  }
  0x63   : > { %1297 = vst.msk [vmem:[%s1926_s26 + $0x20] sm:$0xff] %vm329_vm1, %v1702_v0  ;;  %1298 = vst.msk [vmem:[%s1926_s26 + $0x28] sm:$0xff] %vm329_vm1, %v1702_v0  ;;  %1369 = vmatpush3.msra.mxu0 %v355_v1  ;;  %v361_v6 = vsel %vm359_vm2, %v357_v2, 1.0  ;;  %vm358_vm3 = vcmp.gt.f32.partialorder %v356_v4, 0.0  ;;  %v630_v7 = vpack.c.bf16 %v357_v2, %v356_v4  ;;  %v2005_v29 = vsel %vm359_vm2, 1.0, %v1702_v0  ;;  %s1417_s18 = smul.u32 48, %s1906_s20 }
  0x64   : > { %1301 = vst.msk [vmem:[%s1926_s26 + $0x30] sm:$0xff] %vm329_vm1, %v1702_v0  ;;  %1302 = vst.msk [vmem:[%s1926_s26 + $0x38] sm:$0xff] %vm329_vm1, %v1702_v0  ;;  %1370 = vmatprep.subr.mxu0 %v1702_v0  ;;  %1508 = vrcp.f32 %v361_v6  ;;  %v360_v9 = vsel %vm358_vm3, %v356_v4, 1.0  ;;  %v2001_v28 = vsel %vm358_vm3, 1.0, %v1702_v0  ;;  %v421_v32 = vrot.slane %v2005_v29, 7  ;;  %s1431_s0 = smul.u32 768, %s1769_s25 }
  0x65   : > { %1305 = vst.msk [vmem:[%s1926_s26 + $0x40] sm:$0xff] %vm329_vm1, %v1702_v0  ;;  %1306 = vst.msk [vmem:[%s1926_s26 + $0x48] sm:$0xff] %vm329_vm1, %v1702_v0  ;;  %1371 = vmatpush3.msra.mxu0 %v354_v3  ;;  %1510 = vrcp.f32 %v360_v9  ;;  %v1503_v30 = vpack.i.bf16 %v2005_v29, %v2001_v28  ;;  %s2011_s12 = scalar_lea.vmem [#allocation8], %s1417_s18  ;;  %v420_v33 = vrot.slane %v2001_v28, 7  ;;  %vm929_vm7 = vcmask 1043456   ;;  %s1085_s19 = sand.u32 1, %s1769_s25  }
  0x66   : > { %1309 = vst.msk [vmem:[%s1926_s26 + $0x50] sm:$0xff] %vm329_vm1, %v1702_v0  ;;  %1310 = vst.msk [vmem:[%s1926_s26 + $0x58] sm:$0xff] %vm329_vm1, %v1702_v0  ;;  %1382 = vmatprep.subr.bf16.mxu0 %v1702_v0  ;;  %vm771_vm9 = vcmask 60416   ;;  %v371_v57 = vshrl.u32 %v368_v56, 7  ;;  %vm390_vm11 = vcmask 7168   ;;  %vm1073_vm13 = vcmask 25600  }
  0x67   : > { %v480_v5 = vld [vmem:[%s2286_s2] sm:$0xff]  ;;  %1504 = vrot.lane.b32.xlu0 %v1503_v30, %s1704_s14  ;;  %1299 = vst.msk [vmem:[%s2011_s12 + $0x10] sm:$0xf] %vm333_vm5, %v1705_v31  ;;  %1300 = vst.msk [vmem:[%s2011_s12 + $0x14] sm:$0xf] %vm333_vm5, %v1705_v31  ;;  %v422_v34 = vsel %vm409_vm4, %v420_v33, %v421_v32  ;;  %v425_v35 = vsel %vm409_vm4, 0.0, %v420_v33 }
  0x68   : > { %v482_v8 = vld [vmem:[%s2287_s3 + $0x8] sm:$0xff]  ;;  %1373 = vmatmul.mubr.msk.f32.vlgmr.msra.gmra.mxu0 %vm329_vm1, %v480_v5  ;;  %v629_v10 = vpack.c.bf16 %v480_v5, %v480_v5  ;;  %v1966_v11 = vld [vmem:[%s2287_s3] sm:$0xff]  ;;  %1304 = vst.msk [vmem:[%s2011_s12 + $0x1c] sm:$0xf] %vm333_vm5, %v1705_v31  ;;  %1308 = vst.msk [vmem:[%s2011_s12 + $0x24] sm:$0xf] %vm333_vm5, %v1705_v31  ;;  %v426_v37 = vmul.f32 %v425_v35, %v2001_v28  ;;  %v427_v38 = vmul.f32 %v422_v34, %v2005_v29 }
  0x69   : > { %1376 = vmatpush3.msra.mxu1 %v482_v8  ;;  %1383 = vmatpush3.bf16.msra.mxu0 %v630_v7  ;;  %v675_v20 = vpack.c.bf16 %v482_v8, %v1966_v11  ;;  %1312 = vst.msk [vmem:[%s2011_s12 + $0x2c] sm:$0xf] %vm333_vm5, %v1705_v31  ;;  %1303 = vst.msk [vmem:[%s2011_s12 + $0x18] sm:$0xf] %vm333_vm5, %v1705_v31  ;;  %v776_v36 = vld [vmem:[%s2286_s2] sm:$0xf] }
  0x6a   : > { %1384 = vmatprep.mubr.msk.bf16.mxu0 %vm1703_vm0, %v1702_v0  ;;  %1377 = vmatprep.subr.mxu1 %v1702_v0  ;;  %1307 = vst.msk [vmem:[%s2011_s12 + $0x20] sm:$0xf] %vm333_vm5, %v1705_v31  ;;  %1311 = vst.msk [vmem:[%s2011_s12 + $0x28] sm:$0xf] %vm333_vm5, %v1705_v31  ;;  %v1348_v40 = vpack.c.bf16 %v426_v37, %v426_v37  ;;  %v1349_v41 = vpack.c.bf16 %v427_v38, %v427_v38  ;;  %vm376_vm10 = vcmp.ge.s32.totalorder %v371_v57, 1  ;;  %vm1048_vm14 = vcmask 27648  }
  0x6b   : > { %1394 = vmatprep.subr.mxu0 %v1702_v0  ;;  %1378 = vmatpush3.msra.mxu1 %v1966_v11  ;;  %v924_v48 = vpack.c.bf16 %v776_v36, %v776_v36  ;;  %v2063_v62 = vsel %vm376_vm10, 1.0, %v1702_v0  ;;  %v441_v2 = vsel %vm329_vm1, %v426_v37, 0.0  ;;  %s2288_s5 = sld [smem:[#allocation22_spill]]  ;;  %s1119_s16 = sshll.u32 %s2011_s12, 4  ;;  %s2149_s16 = int_to_ptr.vmem [resolvable:$true] %s1119_s16 }
  0x6c   : > { %1385 = vmatmul.mubr.msk.bf16.vlgmr.msra.gmra.mxu0 %vm329_vm1, %v629_v10  ;;  %1388 = vmatprep.subr.bf16.mxu1 %v1702_v0  ;;  %1321 = vst.msk [vmem:[%s2011_s12 + $0x8] sm:$0xf] %vm333_vm5, %v1348_v40  ;;  %1322 = vst.msk [vmem:[%s2011_s12 + $0xc] sm:$0xf] %vm333_vm5, %v1349_v41  ;;  %s2151_s11 = scalar_lea.sflag [#allocation9], %s1085_s19  ;;  %s1572_s28 = scalar_lea.vmem %s2149_s16, 768 }
  0x6d   : > { %1396 = vmatprep.mubr.msk.f32.mxu0 %vm1703_vm0, %v1702_v0  ;;  %p1573_p13 = scmp.ne.s32.totalorder %s2149_s16, %s1572_s28  ;;  %p2289_p1 = scmp.ne.s32.totalorder %s2277_s9, 0 }
  0x6e   : > { %s1706_s29 = smov [#allocation8]  }
  0x6f   : > { %p1574_p12 = pnand %p1573_p13, %p2289_p1 }
  0x71   : > { %v1509_v12 = vpop.eup %1508  ;;  %s2146_s17 = scalar_lea.hbm %s2288_s5, %s1431_s0  ;;  %p1575_p7 = pneg %p1574_p12 }
  0x72   : > { %v1511_v13 = vpop.eup %1510  ;;  %v1977_v14 = vmul.f32 %v1509_v12, %v355_v1  ;;  %v974_v12 = vpack.c.bf16 %v1966_v11, %v1966_v11 }
  0x73   : > { %v1979_v15 = vmul.f32 %v1511_v13, %v354_v3  ;;  %v442_v3 = vsel %vm329_vm1, %v427_v38, 0.0 }
  0x74   : > { %v411_v16 = vrot.slane %v1977_v14, 7  ;;  %v443_v4 = vadd.f32 %v442_v3, %v441_v2  ;;  %v979_v13 = vsel %vm929_vm7, %v974_v12, 0 }
  0x75   : > { %v410_v17 = vrot.slane %v1979_v15, 7 }
  0x77   : > { %v412_v18 = vsel %vm409_vm4, %v410_v17, %v411_v16 }
  0x78   : > { %v417_v19 = vsub.f32 %v1977_v14, %v412_v18 }
  0x7a   : > { %1318 = vst.msk [vmem:[%s1926_s26 + $0x18] sm:$0xff] %vm329_vm1, %v417_v19 }
  0xd9   : > { %v1505_v5 = vpop.permute.xlu0 %1504 }
 0x128   : > { %v552_v21 = vpop.f32.mrf.mxu0 }
 0x129   : > { %1380 = vmatmul.mubr.msk.f32.vlgmr.msra.gmra.mxu1 %vm329_vm1, %v552_v21 }
 0x12a   : > { %v1374_v22 = vpop.f32.mrf.mxu0  ;;  %1389 = vmatpush3.bf16.msra.mxu1 %v675_v20  ;;  %1390 = vmatprep.mubr.msk.bf16.mxu1 %vm1703_vm0, %v1702_v0 }
 0x12b   : > { %1399 = vmatprep.subr.mxu1 %v1702_v0 }
 0x12c   : > { %v668_v23 = vpop.f32.mrf.mxu0 }
 0x12d   : > { %v674_v24 = vpack.c.bf16 %v668_v23, %v668_v23 }
 0x12e   : > { %v1386_v25 = vpop.f32.mrf.mxu0 }
 0x12f   : > { %1391 = vmatmul.mubr.msk.bf16.vlgmr.msra.gmra.mxu1 %vm329_vm1, %v674_v24  ;;  %v1506_v24 = vunpack.i.l.bf16 %v1505_v5 }
 0x130   : > { %v671_v26 = vpop.f32.mrf.mxu0  ;;  %1400 = vmatpush3.msra.mxu1 %v1966_v11  ;;  %1401 = vmatprep.mubr.msk.f32.mxu1 %vm1703_vm0, %v1702_v0  ;;  %v1507_v11 = vunpack.i.h.bf16 %v1505_v5 }
 0x131   : > { %1410 = vmatprep.subr.bf16.mxu1 %v1702_v0  ;;  %v405_v26 = vsel %vm390_vm11, 0.0, %v1506_v24 }
 0x132   : > { %v1387_v27 = vpop.f32.mrf.mxu0  ;;  %v406_v25 = vsel %vm390_vm11, 0.0, %v1507_v11  ;;  %v369_v11 = vand.u32 127, %v368_v56 }
 0x133   : > { %v407_v27 = vmul.f32 %v405_v26, %v2001_v28  ;;  %v408_v30 = vmul.f32 %v406_v25, %v2005_v29 }
 0x134   : > { %vm373_vm15 = vcmp.ge.s32.totalorder %v369_v11, 1 }
 0x135   : > { %v428_v31 = vsel %vm329_vm1, %v407_v27, 0.0  ;;  %v429_v32 = vsel %vm329_vm1, %v408_v30, 0.0  ;;  %v1346_v33 = vpack.c.bf16 %v407_v27, %v407_v27  ;;  %v1347_v34 = vpack.c.bf16 %v408_v30, %v408_v30 }
 0x136   : > { %v430_v35 = vadd.f32 %v429_v32, %v428_v31  ;;  %v2131_v56 = vsel %vm373_vm15, 1.0, %v1702_v0 }
 0x137   : > { %464 = vst.msk [vmem:[%s2011_s12] sm:$0xf] %vm333_vm5, %v1346_v33  ;;  %465 = vst.msk [vmem:[%s2011_s12 + $0x4] sm:$0xf] %vm333_vm5, %v1347_v34 }
 0x1e9   : > { %v625_v39 = vpop.f32.mrf.mxu1 }
 0x1ea   : > { %1395 = vmatpush3.msra.mxu0 %v625_v39 }
 0x1eb   : > { %v1381_v42 = vpop.f32.mrf.mxu1  ;;  %1397 = vmatmul.mubr.msk.f32.vlgmr.msra.gmra.mxu0 %vm746_vm6, %v776_v36  ;;  %1404 = vmatprep.subr.bf16.mxu0 %v1702_v0 }
 0x1ec   : > { %1406 = vmatprep.mubr.msk.bf16.mxu0 %vm1703_vm0, %v1702_v0 }
 0x1ef   : > { %v713_v43 = vpop.f32.mrf.mxu1 }
 0x1f0   : > { %vm719_vm8 = vcmp.gt.f32.partialorder %v713_v43, 0.0  ;;  %v925_v44 = vpack.c.bf16 %v713_v43, %v713_v43 }
 0x1f1   : > { %v720_v45 = vsel %vm719_vm8, %v713_v43, 4.0  ;;  %v1392_v46 = vpop.f32.mrf.mxu1  ;;  %v723_v47 = vsel %vm719_vm8, 1.0, %v1702_v0 }
 0x1f2   : > { %1512 = vrcp.f32 %v720_v45  ;;  %732 = vrot.lane.b32.xlu0 %v723_v47, %s1704_s14  ;;  %v931_v49 = vsel %vm929_vm7, %v925_v44, 0  ;;  %v742_v50 = vrot.slane %v723_v47, 7  ;;  %v415_v46 = vsel %vm409_vm4, 0.0, %v410_v17 }
 0x1f3   : > { %v716_v51 = vpop.f32.mrf.mxu1  ;;  %1405 = vmatpush3.bf16.msra.mxu0 %v931_v49 }
 0x1f4   : > { %v744_v52 = vsel %vm409_vm4, 0.0, %v742_v50 }
 0x1f5   : > { %v1393_v53 = vpop.f32.mrf.mxu1  ;;  %v2050_v54 = vmul.f32 %v744_v52, %v723_v47 }
 0x1f6   : > { %1407 = vmatmul.mubr.msk.bf16.vlgmr.msra.gmra.mxu0 %vm746_vm6, %v924_v48  ;;  %v416_v48 = vsub.f32 %v1979_v15, %v415_v46 }
 0x1f7   : > { %v774_v55 = vpack.c.bf16 %v2050_v54, %v2050_v54  ;;  %v758_v17 = vsel %vm746_vm6, %v2050_v54, 0.0 }
 0x1f8   : > { %v418_v51 = vmul.f32 %v2063_v62, %v416_v48 }
 0x1f9   : > { %1330 = vst.msk [vmem:[%s2011_s12 + $0x18] sm:$0xf] %vm771_vm9, %v774_v55 }
 0x1fa   : > { %1317 = vst.msk [vmem:[%s1926_s26 + $0x10] sm:$0xff] %vm329_vm1, %v418_v51 }
 0x1ff   : > { %v1513_v58 = vpop.eup %1512 }
 0x200   : > { %v2058_v59 = vmul.f32 %v1513_v58, %v625_v39 }
 0x202   : > { %v737_v60 = vrot.slane %v2058_v59, 7 }
 0x204   : > { %v739_v61 = vsel %vm409_vm4, 0.0, %v737_v60 }
 0x205   : > { %v740_v63 = vsub.f32 %v2058_v59, %v739_v61 }
 0x207   : > { %v741_v1 = vmul.f32 %v2063_v62, %v740_v63 }
 0x209   : > { %1329 = vst.msk [vmem:[%s1926_s26 + $0x30] sm:$0xff] %vm746_vm6, %v741_v1 }
 0x211   : > { %444 = vadd.xlane.f32.xlu0 %v443_v4 }
 0x264   : > { %v733_v6 = vpop.permute.xlu0 %732 }
 0x265   : > { %v735_v7 = vsel %vm390_vm11, 0.0, %v733_v6 }
 0x266   : > { %v736_v8 = vmul.f32 %v735_v7, %v723_v47 }
 0x268   : > { %v770_v9 = vpack.c.bf16 %v736_v8, %v736_v8  ;;  %v747_v10 = vsel %vm746_vm6, %v736_v8, 0.0 }
 0x269   : > { %748 = vadd.xlane.f32.xlu0 %v747_v10 }
 0x26a   : > { %1328 = vst.msk [vmem:[%s2011_s12 + $0x10] sm:$0xf] %vm771_vm9, %v770_v9 }
 0x29a   : > { %v445_v54 = vpop.xlane.xlu0 %444 }
 0x29b   : > { %v446_v1 = vrot.slane %v445_v54, 4 }
 0x29d   : > { %v447_v4 = vadd.f32 %v446_v1, %v445_v54 }
 0x29f   : > { %v448_v6 = vrot.slane %v447_v4, 2 }
 0x2a1   : > { %v449_v10 = vadd.f32 %v448_v6, %v447_v4 }
 0x2ab   : > { %v847_v16 = vpop.f32.mrf.mxu0 }
 0x2ac   : > { %1402 = vmatmul.mubr.msk.f32.vlgmr.msra.gmra.mxu1 %vm746_vm6, %v847_v16 }
 0x2ad   : > { %v1398_v18 = vpop.f32.mrf.mxu0  ;;  %1411 = vmatpush3.bf16.msra.mxu1 %v979_v13  ;;  %1412 = vmatprep.mubr.msk.bf16.mxu1 %vm1703_vm0, %v1702_v0 }
 0x2b6   : > { %v967_v19 = vpop.f32.mrf.mxu0 }
 0x2b7   : > { %v973_v20 = vpack.c.bf16 %v967_v19, %v967_v19 }
 0x2b8   : > { %v1408_v21 = vpop.f32.mrf.mxu0 }
 0x2b9   : > { %1413 = vmatmul.mubr.msk.bf16.vlgmr.msra.gmra.mxu1 %vm746_vm6, %v973_v20  ;;  %v450_v20 = vrot.slane %v449_v10, 1 }
 0x2ba   : > { %v970_v22 = vpop.f32.mrf.mxu0 }
 0x2bb   : > { %v451_v27 = vadd.f32 %v450_v20, %v449_v10 }
 0x2bc   : > { %v1409_v23 = vpop.f32.mrf.mxu0 }
 0x2f2   : > { %v749_v2 = vpop.xlane.xlu0 %748 }
 0x2f3   : > { %v750_v3 = vrot.slane %v749_v2, 4 }
 0x2f5   : > { %v751_v5 = vadd.f32 %v750_v3, %v749_v2 }
 0x2f7   : > { %v752_v8 = vrot.slane %v751_v5, 2 }
 0x2f9   : > { %v753_v19 = vadd.f32 %v752_v8, %v751_v5 }
 0x2fb   : > { %v754_v26 = vrot.slane %v753_v19, 1 }
 0x2fd   : > { %v755_v34 = vadd.f32 %v754_v26, %v753_v19 }
 0x36c   : > { %v920_v36 = vpop.f32.mrf.mxu1 }
 0x36e   : > { %v1403_v37 = vpop.f32.mrf.mxu1 }
 0x379   : > { %v1015_v38 = vpop.f32.mrf.mxu1 }
 0x37a   : > { %vm1021_vm12 = vcmp.gt.f32.partialorder %v1015_v38, 0.0 }
 0x37b   : > { %v1022_v39 = vsel %vm1021_vm12, %v1015_v38, 16.0  ;;  %v1025_v28 = vsel %vm1021_vm12, 1.0, %v1702_v0  ;;  %v1414_v29 = vpop.f32.mrf.mxu1 }
 0x37c   : > { %1514 = vrcp.f32 %v1022_v39  ;;  %1034 = vrot.lane.b32.xlu1 %v1025_v28, %s1704_s14  ;;  %v1044_v40 = vrot.slane %v1025_v28, 7 }
 0x37d   : > { %v1018_v41 = vpop.f32.mrf.mxu1 }
 0x37e   : > { %v1046_v42 = vsel %vm409_vm4, 0.0, %v1044_v40 }
 0x37f   : > { %v1415_v43 = vpop.f32.mrf.mxu1  ;;  %v1047_v44 = vmul.f32 %v1046_v42, %v1025_v28 }
 0x381   : > { %v1076_v45 = vpack.c.bf16 %v1047_v44, %v1047_v44  ;;  %v1060_v57 = vsel %vm1048_vm14, %v1047_v44, 0.0 }
 0x383   : > { %1338 = vst.msk [vmem:[%s2011_s12 + $0x28] sm:$0x3] %vm1073_vm13, %v1076_v45 }
 0x389   : > { %v1515_v47 = vpop.eup %1514 }
 0x38a   : > { %v2101_v49 = vmul.f32 %v1515_v47, %v920_v36 }
 0x38c   : > { %v1039_v50 = vrot.slane %v2101_v49, 7 }
 0x38e   : > { %v1041_v52 = vsel %vm409_vm4, 0.0, %v1039_v50 }
 0x38f   : > { %v1042_v53 = vsub.f32 %v2101_v49, %v1041_v52 }
 0x391   : > { %v1043_v55 = vmul.f32 %v2063_v62, %v1042_v53 }
 0x393   : > { %1337 = vst.msk [vmem:[%s1926_s26 + $0x50] sm:$0xf] %vm1048_vm14, %v1043_v55 }
 0x3a0   : > { %431 = vadd.xlane.f32.xlu1 %v430_v35 }
 0x3a4   : > { %759 = vadd.xlane.f32.xlu1 %v758_v17 }
 0x3a8   : > { %1061 = vadd.xlane.f32.xlu1 %v1060_v57 }
 0x3b9   : > { %386 = vrot.lane.b32.xlu1 %v1977_v14, %s1704_s14 }
 0x3bd   : > { %725 = vrot.lane.b32.xlu1 %v2058_v59, %s1704_s14 }
 0x3ee   : > { %v1035_v58 = vpop.permute.xlu1 %1034 }
 0x3ef   : > { %v1037_v60 = vsel %vm390_vm11, 0.0, %v1035_v58 }
 0x3f0   : > { %v1038_v61 = vmul.f32 %v1037_v60, %v1025_v28 }
 0x3f2   : > { %v1072_v62 = vpack.c.bf16 %v1038_v61, %v1038_v61  ;;  %v1049_v63 = vsel %vm1048_vm14, %v1038_v61, 0.0 }
 0x3f3   : > { %1050 = vadd.xlane.f32.xlu0 %v1049_v63 }
 0x3f4   : > { %1336 = vst.msk [vmem:[%s2011_s12 + $0x20] sm:$0x3] %vm1073_vm13, %v1072_v62 }
 0x409   : > { %384 = vrot.lane.b32.xlu0 %v1979_v15, %s1704_s14 }
 0x40d   : > { %1027 = vrot.lane.b32.xlu0 %v2101_v49, %s1704_s14  ;;  %s1576_s14 = sshll.u32 %s1706_s29, 4  ;;  %s1577_s14 = int_to_ptr.vmem [resolvable:$false] %s1576_s14 }
 0x40e   : > { %s1578_s18 = scalar_lea.vmem %s1577_s14, 1536  ;;  %p1579_p10 = scmp.lt.s32.totalorder %s2149_s16, %s1577_s14 }
 0x40f   : > { %p1580_p0 = scmp.lt.s32.totalorder %s1578_s18, %s1572_s28 }
 0x411   : > { %p1581_p2 = por %p1580_p0, %p1579_p10 }
 0x413   : > { %p1582_p4 = pnand %p1581_p2, %p1575_p7 }
 0x429   : > { %v432_v7 = vpop.xlane.xlu1 %431 }
 0x42a   : > { %v433_v9 = vrot.slane %v432_v7, 4 }
 0x42c   : > { %v434_v12 = vadd.f32 %v433_v9, %v432_v7 }
 0x42d   : > { %v760_v13 = vpop.xlane.xlu1 %759 }
 0x42e   : > { %v435_v16 = vrot.slane %v434_v12, 2  ;;  %v761_v18 = vrot.slane %v760_v13, 4 }
 0x430   : > { %v762_v21 = vadd.f32 %v761_v18, %v760_v13  ;;  %v436_v22 = vadd.f32 %v435_v16, %v434_v12 }
 0x431   : > { %v1062_v23 = vpop.xlane.xlu1 %1061 }
 0x432   : > { %v763_v24 = vrot.slane %v762_v21, 2  ;;  %v437_v25 = vrot.slane %v436_v22, 1 }
 0x434   : > { %v438_v30 = vadd.f32 %v437_v25, %v436_v22  ;;  %v764_v31 = vadd.f32 %v763_v24, %v762_v21 }
 0x435   : > { %v387_v32 = vpop.permute.xlu1 %386 }
 0x436   : > { %v392_v33 = vsel %vm390_vm11, 0.0, %v387_v32  ;;  %1418 = vpush %v438_v30  ;;  %v765_v35 = vrot.slane %v764_v31, 1 }
 0x437   : > { %v394_v36 = vsub.f32 %v1977_v14, %v392_v33  ;;  %1420 = vpush %v451_v27 }
 0x438   : > { %1422 = vpush %v755_v34  ;;  %v766_v37 = vadd.f32 %v765_v35, %v764_v31 }
 0x439   : > { %v396_v38 = vmul.f32 %v2131_v56, %v394_v36  ;;  %v726_v39 = vpop.permute.xlu1 %725 }
 0x43a   : > { %v728_v28 = vsel %vm390_vm11, 0.0, %v726_v39  ;;  %1424 = vpush %v766_v37 }
 0x43b   : > { %455 = vst.msk [vmem:[%s1926_s26 + $0x8] sm:$0xff] %vm329_vm1, %v396_v38  ;;  %v729_v29 = vsub.f32 %v2058_v59, %v728_v28 }
 0x43d   : > { %v730_v14 = vmul.f32 %v2131_v56, %v729_v29 }
 0x43f   : > { %1327 = vst.msk [vmem:[%s1926_s26 + $0x20] sm:$0xff] %vm746_vm6, %v730_v14 }
 0x440   : > { %1585 = shalt.err (!%p1582_p4)
}
 0x441   : > { %s1586_s12 = scalar_lea.hbm %s2146_s17, 768  ;;  %s1590_s0 = scalar_lea.hbm %s2288_s5, 1536 }
 0x442   : > { %p1587_p9 = scmp.ne.s32.totalorder %s2146_s17, %s1586_s12  ;;  %p1591_p5 = scmp.lt.s32.totalorder %s2146_s17, %s2288_s5 }
 0x443   : > { %p1592_p8 = scmp.lt.s32.totalorder %s1590_s0, %s1586_s12 }
 0x444   : > { %p1588_p11 = pnand %p1587_p9, %p2289_p1 }
 0x445   : > { %p1593_p6 = por %p1592_p8, %p1591_p5 }
 0x446   : > { %p1589_p3 = pneg %p1588_p11 }
 0x448   : > { %p1594_p13 = pnand %p1593_p6, %p1589_p3 }
 0x44a   : > { %1597 = shalt.err (!%p1594_p13)
}
 0x44b   : > { %s1707_s8 = smov 64   ;;  %s1708_s28 = smov 4   ;;  %v1063_v0 = vrot.slane %v1062_v23, 4 }
 0x44c   : > { %1437 = dma.vmem_to_hbm [thread:$0]  (%p2289_p1), %s2149_s16, 768, %s2146_s17, %s2151_s11, %s1707_s8, %s1707_s8, %s1708_s28  }
 0x44d   : > { %v1064_v59 = vadd.f32 %v1063_v0, %v1062_v23  ;;  %s1430_s17 = smul.u32 1536, %s1769_s25  ;;  %s1103_s16 = sshll.u32 %s1926_s26, 4  ;;  %s2183_s16 = int_to_ptr.vmem [resolvable:$true] %s1103_s16 }
 0x44e   : > { %s2290_s4 = sld [smem:[#allocation21_spill]]  ;;  %s1081_s12 = scalar_lea.sflag [#allocation4], %s1906_s20 }
 0x44f   : > { %v1065_v40 = vrot.slane %v1064_v59, 2  ;;  %s1598_s13 = scalar_lea.vmem %s2183_s16, 1536  ;;  %s1709_s15 = smov [#allocation7]  }
 0x450   : > { %p1599_p12 = scmp.ne.s32.totalorder %s2183_s16, %s1598_s13  ;;  %s1602_s0 = sshll.u32 %s1709_s15, 4  ;;  %s1603_s0 = int_to_ptr.vmem [resolvable:$false] %s1602_s0 }
 0x451   : > { %v1066_v45 = vadd.f32 %v1065_v40, %v1064_v59  ;;  %s1604_s19 = scalar_lea.vmem %s1603_s0, 3072  ;;  %p1605_p0 = scmp.lt.s32.totalorder %s2183_s16, %s1603_s0 }
 0x452   : > { %p1600_p7 = pnand %p1599_p12, %p2289_p1  ;;  %p1606_p2 = scmp.lt.s32.totalorder %s1604_s19, %s1598_s13 }
 0x453   : > { %v1067_v53 = vrot.slane %v1066_v45, 1 }
 0x454   : > { %s2189_s18 = scalar_lea.hbm %s2290_s4, %s1430_s17  ;;  %p1601_p10 = pneg %p1600_p7 }
 0x455   : > { %v1068_v60 = vadd.f32 %v1067_v53, %v1066_v45  ;;  %p1607_p4 = por %p1606_p2, %p1605_p0 }
 0x457   : > { %p1608_p9 = pnand %p1607_p4, %p1601_p10 }
 0x47c   : > { %v1051_v41 = vpop.xlane.xlu0 %1050 }
 0x47d   : > { %v1052_v42 = vrot.slane %v1051_v41, 4 }
 0x47f   : > { %v1053_v43 = vadd.f32 %v1052_v42, %v1051_v41 }
 0x480   : > { %v385_v44 = vpop.permute.xlu0 %384 }
 0x481   : > { %v1054_v46 = vrot.slane %v1053_v43, 2  ;;  %v391_v47 = vsel %vm390_vm11, 0.0, %v385_v44 }
 0x482   : > { %v393_v48 = vsub.f32 %v1979_v15, %v391_v47 }
 0x483   : > { %v1055_v50 = vadd.f32 %v1054_v46, %v1053_v43 }
 0x484   : > { %v395_v51 = vmul.f32 %v2131_v56, %v393_v48  ;;  %v1028_v52 = vpop.permute.xlu0 %1027 }
 0x485   : > { %v1030_v55 = vsel %vm390_vm11, 0.0, %v1028_v52  ;;  %v1056_v17 = vrot.slane %v1055_v50, 1 }
 0x486   : > { %454 = vst.msk [vmem:[%s1926_s26] sm:$0xff] %vm329_vm1, %v395_v51  ;;  %v1031_v57 = vsub.f32 %v2101_v49, %v1030_v55 }
 0x487   : > { %v1057_v58 = vadd.f32 %v1056_v17, %v1055_v50 }
 0x488   : > { %v1032_v15 = vmul.f32 %v2131_v56, %v1031_v57 }
 0x489   : > { %1426 = vpush %v1057_v58 }
 0x48a   : > { %1335 = vst.msk [vmem:[%s1926_s26 + $0x40] sm:$0xf] %vm1048_vm14, %v1032_v15 }
 0x48b   : > { %1428 = vpush %v1068_v60 }
 0x48c   : > { %1611 = shalt.err (!%p1608_p9)
}
 0x48d   : > { %s1612_s26 = scalar_lea.hbm %s2189_s18, 1536  ;;  %s1616_s28 = scalar_lea.hbm %s2290_s4, 3072 }
 0x48e   : > { %p1613_p11 = scmp.ne.s32.totalorder %s2189_s18, %s1612_s26  ;;  %p1617_p8 = scmp.lt.s32.totalorder %s2189_s18, %s2290_s4 }
 0x48f   : > { %p1618_p6 = scmp.lt.s32.totalorder %s1616_s28, %s1612_s26 }
 0x490   : > { %p1614_p3 = pnand %p1613_p11, %p2289_p1 }
 0x491   : > { %p1619_p13 = por %p1618_p6, %p1617_p8 }
 0x492   : > { %p1615_p5 = pneg %p1614_p3 }
 0x494   : > { %p1620_p12 = pnand %p1619_p13, %p1615_p5 }
 0x496   : > { %1623 = shalt.err (!%p1620_p12)
}
 0x497   : > { %s1710_s14 = smov 128   ;;  %s1711_s13 = smov 8  }
 0x498   : > { %1436 = dma.vmem_to_hbm [thread:$0]  (%p2289_p1), %s2183_s16, 1536, %s2189_s18, %s1081_s12, %s1710_s14, %s1710_s14, %s1711_s13  }
 0x499   : > { %s1419_s15 = spop %1418  ;;  %s326_s29 = scalar_lea.vmem [#allocation10], %s1906_s20 }
 0x49a   : > { %s1421_s0 = spop %1420  ;;  %s1135_s1 = sshll.u32 %s326_s29, 4  ;;  %s1136_s1 = int_to_ptr.vmem [resolvable:$true] %s1135_s1 }
 0x49b   : > { %s453_s19 = sadd.f32 %s1421_s0, %s1419_s15  ;;  %s1423_s7 = spop %1422 }
 0x49c   : > { %s1425_s26 = spop %1424  ;;  %s1341_s3 = sshll.u32 %s1769_s25, 4 }
 0x49d   : > { %s757_s8 = sadd.f32 %s1423_s7, %s453_s19  ;;  %s1133_s16 = scalar_lea.hbm %s2260_s6, %s1341_s3 }
 0x49e   : > { %s1624_s18 = scalar_lea.vmem %s1136_s1, 16  ;;  %s1712_s12 = smov [#allocation10]  }
 0x49f   : > { %s768_s28 = sadd.f32 %s1425_s26, %s757_s8  ;;  %p1625_p7 = scmp.ne.s32.totalorder %s1136_s1, %s1624_s18 }
 0x4a0   : > { %s1628_s14 = sshll.u32 %s1712_s12, 4  ;;  %s1629_s14 = int_to_ptr.vmem [resolvable:$false] %s1628_s14 }
 0x4a1   : > { %p1626_p10 = pnand %p1625_p7, %p2289_p1  ;;  %s1630_s20 = scalar_lea.vmem %s1629_s14, 32 }
 0x4a2   : > { %p1631_p2 = scmp.lt.s32.totalorder %s1136_s1, %s1629_s14  ;;  %p1632_p4 = scmp.lt.s32.totalorder %s1630_s20, %s1624_s18 }
 0x4a3   : > { %p1627_p0 = pneg %p1626_p10 }
 0x4a4   : > { %p1633_p9 = por %p1632_p4, %p1631_p2 }
 0x4a6   : > { %p1634_p11 = pnand %p1633_p9, %p1627_p0 }
 0x4ba   : > { %s1427_s17 = spop %1426 }
 0x4bb   : > { %s1059_s2 = sadd.f32 %s1427_s17, %s768_s28 }
 0x4bc   : > { %s1429_s4 = spop %1428 }
 0x4bd   : > { %s1070_s5 = sadd.f32 %s1429_s4, %s1059_s2 }
 0x4bf   : > { %v1078_v49 = vstv %s1070_s5 }
 0x4c0   : > { %1079 = vst [vmem:[%s326_s29] sm:$0x1] %v1078_v49 }
 0x4c1   : > { %1637 = shalt.err (!%p1634_p11)
}
 0x4c2   : > { %s1638_s2 = scalar_lea.hbm %s1133_s16, 16  ;;  %s1642_s5 = scalar_lea.hbm %s2260_s6, 32 }
 0x4c3   : > { %p1639_p3 = scmp.ne.s32.totalorder %s1133_s16, %s1638_s2  ;;  %p1643_p6 = scmp.lt.s32.totalorder %s1133_s16, %s2260_s6 }
 0x4c4   : > { %p1644_p13 = scmp.lt.s32.totalorder %s1642_s5, %s1638_s2 }
 0x4c5   : > { %p1640_p5 = pnand %p1639_p3, %p2289_p1 }
 0x4c6   : > { %p1645_p12 = por %p1644_p13, %p1643_p6 }
 0x4c7   : > { %p1641_p8 = pneg %p1640_p5 }
 0x4c9   : > { %p1646_p7 = pnand %p1645_p12, %p1641_p8 }
 0x4cb   : > { %1649 = shalt.err (!%p1646_p7)
}
 0x4cc   : > { %1438 = dma.vmem_to_hbm [thread:$0]  (%p2289_p1), %s1136_s1, 16, %s1133_s16, %s2151_s11  }
 0x4cd PF: > { %s1147_s30 = sand.u32 1, %s1684_s21   ;;  %p2291_p10 = scmp.ne.s32.totalorder %s2278_s10, 0 }
 0x4ce   : > { %p2292_p0 = scmp.ge.s32.totalorder %s1696_s24, 2  ;;  %s1148_s13 = scalar_lea.sflag [#allocation4], %s1147_s30 }
 0x4d0   : > { %p1450_p2 = pnand %p2292_p0, %p2291_p10 }
 0x4d2   : > { %p1451_p4 = pneg %p1450_p2 }
 0x4d4   : > { %1675 = dma.done.wait (%p1451_p4), %s1148_s13, 1536  }
 0x4d5   : > { %1677 = vsyncadd (%p1451_p4), %s1148_s13, 4294965760  ;;  %s2293_s15 = sadd.s32 4294967294, %s1696_s24  }
 0x4d6   : > { %s1156_s0 = sand.u32 1, %s2293_s15  }
 0x4d7   : > { %s1157_s19 = scalar_lea.sflag [#allocation9], %s1156_s0 }
 0x4d8   : > { %1679 = dma.done.wait (%p1451_p4), %s1157_s19, 784  }
 0x4d9   : > { %1681 = vsyncadd (%p1451_p4), %s1157_s19, 4294966512  ;;  %s2294_s1 = sld [smem:[#allocation15_spill]]  ;;  %p26_p1 = scmp.ge.s32.totalorder %s1773_s27, 4  }
 0x4da   : > { %s2295_s23 = sld [smem:[#allocation16_spill]]  ;;  %s2296_s21 = smov %s1688_s22 }
 0x4db   : > { %s2298_s24 = smov %s1773_s27  ;;  %28 = sbr.rel (!%p26_p1) target bundleno = 16 (0x10), region = 136 }
 0x4df   : > { %s2297_s22 = smov %s2294_s1 }
 0x4e0   :  { %1170 = vsyncpa [#allocation3], 1 }
 0x4e1   :  { %1172 = vsyncpa [#allocation3 + $0x1], 1 }
 0x4e2   :  { %1173 = vsyncpa [#allocation6], 1 }
 0x4e3   :  { %1175 = vsyncpa [#allocation6 + $0x1], 1 }
 0x4e4   :  { %1176 = vsyncpa [#allocation4], 1 }
 0x4e5   :  { %1178 = vsyncpa [#allocation4 + $0x1], 1 }
 0x4e6   :  { %1179 = vsyncpa [#allocation9], 1 }
 0x4e7   :  { %1181 = vsyncpa [#allocation9 + $0x1], 1 }

</bundles_post_ra>
